<compile_context>
chip_gen: v5e
topology: v5e:2x2
jax: 0.10.0
libtpu: 0.0.40
codegen_flags: <defaults>
</compile_context>

<pallas_src>
import functools

import jax
import jax.numpy as jnp
from jax import lax
from jax.experimental import pallas as pl
from jax.experimental.pallas import tpu as pltpu

VMEM_SPEC = pl.BlockSpec(memory_space=pltpu.MemorySpace.VMEM)


# ----------------------------------------------------------------------------- fused kernel

def _fused_gcn_kernel(h0_ref, pool_ref, nodemask_ref, attsel_ref, wsel_ref, smalls_ref, o_ref,
                      *, n_nodes, heads, hidden, layer_cfg, conv_cfg, blocksel_off):
    n = n_nodes
    hn = heads * n

    # Static per-call tensors reused by every layer (loaded once, hoisted out of the loop).
    mask_add = nodemask_ref[0:n, :].astype(jnp.float32)        # (N, H*N) additive -1e30 adj mask
    dsel = nodemask_ref[n:2 * n, :].astype(jnp.float32)        # (N, H*N) selects row s for col (g,s)
    blocksel = attsel_ref[blocksel_off:blocksel_off + hn, :]   # (H*N, H*N) block-diag ones

    h = h0_ref[...]                                            # (N, hidden) f32 node embeddings
    num_layers = len(layer_cfg)
    for li, (d, bn_rows) in enumerate(layer_cfg):              # static unroll; d = distinct conv idx
        cfg = conv_cfg[d]
        c = cfg["C"]
        hc = heads * c

        # All-head projection: one lane-dense bf16 MXU matmul, f32 accumulate.
        w = wsel_ref[cfg["w_off"]:cfg["w_off"] + hidden, :hc]
        feat = jnp.dot(h.astype(jnp.bfloat16), w, preferred_element_type=jnp.float32)  # (N, H*C)

        # Attention logits for ALL heads, lane-stacked as (N_dst, H*N_src).
        dst_exp = attsel_ref[cfg["dst_off"]:cfg["dst_off"] + hc, :]        # (H*C, H*N)
        src_exp = attsel_ref[cfg["src_off"]:cfg["src_off"] + hc, :]        # (H*C, H*N)
        adst = jnp.dot(feat, dst_exp, preferred_element_type=jnp.float32)  # (N, H*N)
        qsrc = jnp.dot(feat, src_exp, preferred_element_type=jnp.float32)  # (N, H*N)
        asrc = jnp.sum(qsrc * dsel, axis=0, keepdims=True)                 # (1, H*N)

        e = adst + asrc
        e = jnp.maximum(e, 0.2 * e) + mask_add                  # LeakyReLU(0.2) + adjacency mask
        # Shared per-row shift: softmax is shift-invariant per head block, and every block has a
        # self-loop (added in the wrapper) so no block can be fully masked / underflow to zero.
        m = jnp.max(e, axis=-1, keepdims=True)
        p = jnp.exp(e - m)
        den = jnp.dot(p, blocksel, preferred_element_type=jnp.float32)     # per-head sums, bcast
        alpha = p * pl.reciprocal(jnp.maximum(den, 1e-20), approx=True)

        # Head aggregation + head mean (concat=False) as ONE bf16 matmul: alpha (N,H*N) @ F (H*N,C),
        # with F[g*N+s, c] = feat[s, g*C+c] / H built via sublane concat + 0/1 block mask + matmul
        # (no lane-unaligned slices).
        colsel = wsel_ref[cfg["colsel_off"]:cfg["colsel_off"] + hn, :hc]   # (H*N, H*C) block mask
        headsel = wsel_ref[cfg["headsel_off"]:cfg["headsel_off"] + hc, :c]  # (H*C, C) stacked I / H
        feat_rep = jnp.concatenate([feat] * heads, axis=0)                  # (H*N, H*C) f32
        fblk = (feat_rep * colsel.astype(jnp.float32)).astype(jnp.bfloat16)
        fhead = jnp.dot(fblk, headsel, preferred_element_type=jnp.float32)  # (H*N, C)
        out = jnp.dot(alpha.astype(jnp.bfloat16), fhead.astype(jnp.bfloat16),
                      preferred_element_type=jnp.float32)                   # (N, C) mean over heads
        out = out + smalls_ref[cfg["bias_row"]:cfg["bias_row"] + 1, :c]

        if li < num_layers - 1:
            # Fused BatchNorm1d (training-mode batch stats, biased variance) + ReLU.
            g_row, b_row = bn_rows
            gamma = smalls_ref[g_row:g_row + 1, :c]
            beta = smalls_ref[b_row:b_row + 1, :c]
            mean = jnp.sum(out, axis=0, keepdims=True) * (1.0 / n)
            xc = out - mean
            var = jnp.sum(xc * xc, axis=0, keepdims=True) * (1.0 / n)
            h = jnp.maximum(xc * lax.rsqrt(var + 1e-5) * gamma + beta, 0.0)
            # TODO(synk): F.dropout (training=True default in the reference) is stochastic;
            # applied as identity (eval-mode semantics).
        else:
            h = out                                              # return_embeds=True -> raw embeds

    # global_mean_pool as a row-normalized bf16 matmul; the only HBM write.
    o_ref[...] = jnp.dot(pool_ref[...], h.astype(jnp.bfloat16),
                         preferred_element_type=jnp.float32)


# ----------------------------------------------------------------------------- params

def init_params(key, vocab_sizes, hidden_dim, output_dim, num_layers, heads=4):
    def glorot(k, shape, fan_in, fan_out):
        lim = (6.0 / (fan_in + fan_out)) ** 0.5
        return jax.random.uniform(k, shape, jnp.float32, -lim, lim)

    keys = jax.random.split(key, 3 + len(vocab_sizes))
    emb_tables = [glorot(keys[i], (v, hidden_dim), v, hidden_dim)
                  for i, v in enumerate(vocab_sizes)]

    def gat_params(k, fin, cout):
        k1, k2, k3 = jax.random.split(k, 3)
        return dict(
            w=glorot(k1, (fin, heads * cout), fin, heads * cout),
            att_src=glorot(k2, (heads, cout), cout, cout),
            att_dst=glorot(k3, (heads, cout), cout, cout),
            bias=jnp.zeros((1, cout), jnp.float32),
        )

    kf, km, kl = keys[len(vocab_sizes):len(vocab_sizes) + 3]
    conv_first = gat_params(kf, hidden_dim, hidden_dim)
    conv_last = gat_params(kl, hidden_dim, output_dim)
    if num_layers > 2:
        conv_mid = gat_params(km, hidden_dim, hidden_dim)
        convs = [conv_first, conv_mid, conv_last]
        # The PyTorch module reuses ONE GATConv object for all middle layers -> shared weights.
        layer_map = [0] + [1] * (num_layers - 2) + [2]
    else:
        convs = [conv_first, conv_last]
        layer_map = [0, 1]
    bn_gamma = [jnp.ones((1, hidden_dim), jnp.float32) for _ in range(num_layers - 1)]
    bn_beta = [jnp.zeros((1, hidden_dim), jnp.float32) for _ in range(num_layers - 1)]
    return dict(emb_tables=emb_tables, convs=convs, layer_map=layer_map,
                bn_gamma=bn_gamma, bn_beta=bn_beta)


# ----------------------------------------------------------------------------- forward wrapper

def _att_expand(att, n_nodes):
    """(H, C) -> (H*C, H*N): block h (rows h*C:(h+1)*C, cols h*N:(h+1)*N) holds att[h][:, None]."""
    h, c = att.shape
    eye = jnp.eye(h, dtype=att.dtype)
    blockdiag = (att[:, :, None] * eye[:, None, :]).reshape(h * c, h)      # (H*C, H)
    expander = jnp.kron(eye, jnp.ones((1, n_nodes), att.dtype))            # (H, H*N)
    return blockdiag @ expander


def gcn_graph_forward(params, x_atom, adj, pool_mat):
    convs = params["convs"]
    layer_map = params["layer_map"]
    heads = convs[0]["att_src"].shape[0]
    hidden = convs[0]["w"].shape[0]
    n = x_atom.shape[0]
    hn = heads * n
    n_graphs = pool_mat.shape[0]
    out_dim = convs[layer_map[-1]]["att_src"].shape[1]
    lane = max(hidden, heads * max(cv["att_src"].shape[1] for cv in convs))

    # AtomEncoder outside the kernel: plain XLA gathers summed per feature column.
    h0 = jnp.zeros((n, hidden), jnp.float32)
    for i, tbl in enumerate(params["emb_tables"]):
        h0 = h0 + jnp.take(tbl, x_atom[:, i], axis=0)

    # Static node masks (bf16): additive adjacency bias tiled per head + src-selector rows.
    # NOTE: adjacency MUST contain self-loops (GATConv default), so no head block is fully masked.
    mask_add = jnp.where(adj > 0.5, 0.0, -1e30).astype(jnp.float32)        # (N, N) [dst, src]
    nodemask = jnp.concatenate(
        [jnp.tile(mask_add, (1, heads)),
         jnp.tile(jnp.eye(n, dtype=jnp.float32), (1, heads))],
        axis=0).astype(jnp.bfloat16)                                       # (2N, H*N)

    # Pack A (f32, H*N lanes): expanded att_dst/att_src blocks per distinct conv + block-diag ones.
    rows_a, conv_cfg, off_a = [], [], 0
    for cv in convs:
        c = cv["att_src"].shape[1]
        hc = heads * c
        rows_a.append(_att_expand(cv["att_dst"], n))
        rows_a.append(_att_expand(cv["att_src"], n))
        conv_cfg.append(dict(C=c, dst_off=off_a, src_off=off_a + hc))
        off_a += 2 * hc
    blocksel_off = off_a
    rows_a.append(jnp.kron(jnp.eye(heads, dtype=jnp.float32), jnp.ones((n, n), jnp.float32)))
    pack_a = jnp.concatenate(rows_a, axis=0)

    # Pack B (bf16, `lane` lanes): projection weights + per-width block-diag selection matrices.
    rows_b, off_b = [], 0
    for d, cv in enumerate(convs):
        hc = heads * cv["att_src"].shape[1]
        rows_b.append(jnp.zeros((hidden, lane), jnp.float32).at[:, :hc].set(cv["w"]))
        conv_cfg[d]["w_off"] = off_b
        off_b += hidden
    sel_off = {}
    for c in sorted({cv["att_src"].shape[1] for cv in convs}):
        hc = heads * c
        colsel = jnp.kron(jnp.eye(heads, dtype=jnp.float32), jnp.ones((n, c), jnp.float32))
        headsel = jnp.tile(jnp.eye(c, dtype=jnp.float32), (heads, 1)) / heads
        rows_b.append(jnp.zeros((hn, lane), jnp.float32).at[:, :hc].set(colsel))
        rows_b.append(jnp.zeros((hc, lane), jnp.float32).at[:, :c].set(headsel))
        sel_off[c] = (off_b, off_b + hn)
        off_b += hn + hc
    for d, cv in enumerate(convs):
        conv_cfg[d]["colsel_off"], conv_cfg[d]["headsel_off"] = sel_off[cv["att_src"].shape[1]]
    pack_b = jnp.concatenate(rows_b, axis=0).astype(jnp.bfloat16)

    # Pack C (f32, `lane` lanes): conv biases + BN gamma/beta, one row each.
    rows_c, off_c = [], 0
    for d, cv in enumerate(convs):
        c = cv["att_src"].shape[1]
        rows_c.append(jnp.zeros((1, lane), jnp.float32).at[:, :c].set(cv["bias"]))
        conv_cfg[d]["bias_row"] = off_c
        off_c += 1
    bn_rows = []
    for g, b in zip(params["bn_gamma"], params["bn_beta"]):
        rows_c.append(jnp.zeros((1, lane), jnp.float32).at[:, :hidden].set(g))
        rows_c.append(jnp.zeros((1, lane), jnp.float32).at[:, :hidden].set(b))
        bn_rows.append((off_c, off_c + 1))
        off_c += 2
    pack_c = jnp.concatenate(rows_c, axis=0)

    layer_cfg = tuple(
        (layer_map[l], bn_rows[l] if l < len(layer_map) - 1 else (0, 0))
        for l in range(len(layer_map)))

    kernel = functools.partial(
        _fused_gcn_kernel, n_nodes=n, heads=heads, hidden=hidden,
        layer_cfg=layer_cfg, conv_cfg=tuple(conv_cfg), blocksel_off=blocksel_off)
    return pl.pallas_call(
        kernel,
        out_shape=jax.ShapeDtypeStruct((n_graphs, out_dim), jnp.float32),
        in_specs=[VMEM_SPEC] * 6,
        out_specs=VMEM_SPEC,
    )(h0, pool_mat.astype(jnp.bfloat16), nodemask, pack_a, pack_b, pack_c)


# ----------------------------------------------------------------------------- main

if __name__ == "__main__":
    key = jax.random.PRNGKey(0)
    N, G = 16, 2                       # 2 graphs of 8 nodes each
    hidden_dim, output_dim, num_layers, heads = 32, 16, 3, 4
    vocab_sizes = (10, 5, 7)           # synthetic AtomEncoder feature vocabularies

    k_param, k_x, k_e0, k_e1 = jax.random.split(key, 4)
    params = init_params(k_param, vocab_sizes, hidden_dim, output_dim, num_layers, heads)

    # batched_data.x : integer atom features [N, 3]
    x_atom = jnp.stack(
        [jax.random.randint(jax.random.fold_in(k_x, i), (N,), 0, v)
         for i, v in enumerate(vocab_sizes)],
        axis=1,
    ).astype(jnp.int32)

    # batched_data.edge_index : [2, E] with edges kept inside each graph
    e_per_graph = 20
    src0 = jax.random.randint(jax.random.fold_in(k_e0, 0), (e_per_graph,), 0, N // 2)
    dst0 = jax.random.randint(jax.random.fold_in(k_e0, 1), (e_per_graph,), 0, N // 2)
    src1 = jax.random.randint(jax.random.fold_in(k_e1, 0), (e_per_graph,), N // 2, N)
    dst1 = jax.random.randint(jax.random.fold_in(k_e1, 1), (e_per_graph,), N // 2, N)
    edge_index = jnp.stack(
        [jnp.concatenate([src0, src1]), jnp.concatenate([dst0, dst1])], axis=0
    ).astype(jnp.int32)

    # batched_data.batch : graph id per node
    batch = jnp.concatenate([jnp.zeros(N // 2, jnp.int32), jnp.ones(N // 2, jnp.int32)])

    # Dense adjacency mask adj[dst, src] = 1 per edge, plus self-loops (GATConv default; required
    # so every softmax block has at least one unmasked entry).
    adj = jnp.zeros((N, N), jnp.float32)
    adj = adj.at[edge_index[1], edge_index[0]].set(1.0)
    adj = adj.at[jnp.arange(N), jnp.arange(N)].set(1.0)

    # global_mean_pool matrix: [G, N], each row sums to 1 over its graph's nodes.
    onehot_b = jax.nn.one_hot(batch, G, dtype=jnp.float32).T
    pool_mat = onehot_b / jnp.sum(onehot_b, axis=1, keepdims=True)

    out = gcn_graph_forward(params, x_atom, adj, pool_mat)
    jax.block_until_ready(out)
    assert out.shape == (G, output_dim) and out.dtype == jnp.float32
    assert bool(jnp.all(jnp.isfinite(out)))
    print("KERNEL_OK")
</pallas_src>

<mosaic_0001>
module attributes {stable_mosaic.version = 11 : i64} {
  func.func @_fused_gcn_kernel(%arg0: memref<16x32xf32, #tpu.memory_space<vmem>>, %arg1: memref<2x16xbf16, #tpu.memory_space<vmem>>, %arg2: memref<32x64xbf16, #tpu.memory_space<vmem>>, %arg3: memref<704x64xf32, #tpu.memory_space<vmem>>, %arg4: memref<416x128xbf16, #tpu.memory_space<vmem>>, %arg5: memref<7x128xf32, #tpu.memory_space<vmem>>, %arg6: memref<2x16xf32, #tpu.memory_space<vmem>>) attributes {dimension_semantics = [], scalar_prefetch = 0 : i64, scratch_operands = 0 : i64, tpu.core_type = #tpu.core_type<tc>} {
    %c0 = arith.constant 0 : index
    %c0_0 = arith.constant 0 : index
    %0 = vector.load %arg2[%c0, %c0_0] : memref<32x64xbf16, #tpu.memory_space<vmem>>, vector<16x64xbf16>
    %1 = arith.extf %0 : vector<16x64xbf16> to vector<16x64xf32>
    %c16 = arith.constant 16 : index
    %c0_1 = arith.constant 0 : index
    %2 = vector.load %arg2[%c16, %c0_1] : memref<32x64xbf16, #tpu.memory_space<vmem>>, vector<16x64xbf16>
    %3 = arith.extf %2 : vector<16x64xbf16> to vector<16x64xf32>
    %c640 = arith.constant 640 : index
    %c0_2 = arith.constant 0 : index
    %4 = vector.load %arg3[%c640, %c0_2] : memref<704x64xf32, #tpu.memory_space<vmem>>, vector<64x64xf32>
    %c0_3 = arith.constant 0 : index
    %c0_4 = arith.constant 0 : index
    %5 = vector.load %arg0[%c0_3, %c0_4] : memref<16x32xf32, #tpu.memory_space<vmem>>, vector<16x32xf32>
    %c0_5 = arith.constant 0 : index
    %c0_6 = arith.constant 0 : index
    %6 = vector.load %arg4[%c0_5, %c0_6] : memref<416x128xbf16, #tpu.memory_space<vmem>>, vector<32x128xbf16>
    %7 = arith.truncf %5 : vector<16x32xf32> to vector<16x32xbf16>
    %cst = arith.constant dense<0.000000e+00> : vector<16x128xf32>
    %8 = tpu.matmul %7, %6, %cst {dimension_numbers = #tpu.dot_dimension_numbers<[1], [0], [0], [1], [0, 0, 1, 1], [], []>} : vector<16x32xbf16>, vector<32x128xbf16>, vector<16x128xf32> -> vector<16x128xf32>
    %c0_7 = arith.constant 0 : index
    %c0_8 = arith.constant 0 : index
    %9 = vector.load %arg3[%c0_7, %c0_8] : memref<704x64xf32, #tpu.memory_space<vmem>>, vector<128x64xf32>
    %c128 = arith.constant 128 : index
    %c0_9 = arith.constant 0 : index
    %10 = vector.load %arg3[%c128, %c0_9] : memref<704x64xf32, #tpu.memory_space<vmem>>, vector<128x64xf32>
    %cst_10 = arith.constant dense<0.000000e+00> : vector<16x64xf32>
    %11 = tpu.matmul %8, %9, %cst_10 {dimension_numbers = #tpu.dot_dimension_numbers<[1], [0], [0], [1], [0, 0, 1, 1], [], []>} : vector<16x128xf32>, vector<128x64xf32>, vector<16x64xf32> -> vector<16x64xf32>
    %cst_11 = arith.constant dense<0.000000e+00> : vector<16x64xf32>
    %12 = tpu.matmul %8, %10, %cst_11 {dimension_numbers = #tpu.dot_dimension_numbers<[1], [0], [0], [1], [0, 0, 1, 1], [], []>} : vector<16x128xf32>, vector<128x64xf32>, vector<16x64xf32> -> vector<16x64xf32>
    %13 = arith.mulf %12, %3 : vector<16x64xf32>
    %cst_12 = arith.constant dense<0.000000e+00> : vector<64xf32>
    %14 = vector.multi_reduction <add>, %13, %cst_12 [0] : vector<16x64xf32> to vector<64xf32>
    %15 = vector.shape_cast %14 : vector<64xf32> to vector<1x64xf32>
    %16 = vector.broadcast %15 : vector<1x64xf32> to vector<16x64xf32>
    %17 = arith.addf %11, %16 : vector<16x64xf32>
    %cst_13 = arith.constant 2.000000e-01 : f32
    %18 = vector.broadcast %cst_13 : f32 to vector<16x64xf32>
    %19 = arith.mulf %18, %17 : vector<16x64xf32>
    %20 = arith.maximumf %17, %19 : vector<16x64xf32>
    %21 = arith.addf %20, %1 : vector<16x64xf32>
    %cst_14 = arith.constant dense<0xFF800000> : vector<16xf32>
    %22 = vector.multi_reduction <maximumf>, %21, %cst_14 [1] : vector<16x64xf32> to vector<16xf32>
    %23 = vector.shape_cast %22 : vector<16xf32> to vector<16x1xf32>
    %24 = vector.broadcast %23 : vector<16x1xf32> to vector<16x64xf32>
    %25 = arith.subf %21, %24 : vector<16x64xf32>
    %26 = math.exp %25 : vector<16x64xf32>
    %cst_15 = arith.constant dense<0.000000e+00> : vector<16x64xf32>
    %27 = tpu.matmul %26, %4, %cst_15 {dimension_numbers = #tpu.dot_dimension_numbers<[1], [0], [0], [1], [0, 0, 1, 1], [], []>} : vector<16x64xf32>, vector<64x64xf32>, vector<16x64xf32> -> vector<16x64xf32>
    %cst_16 = arith.constant 9.99999968E-21 : f32
    %28 = vector.broadcast %cst_16 : f32 to vector<16x64xf32>
    %29 = arith.maximumf %27, %28 : vector<16x64xf32>
    %30 = tpu.reciprocal %29 {approx = true} : vector<16x64xf32> -> vector<16x64xf32>
    %31 = arith.mulf %26, %30 : vector<16x64xf32>
    %c224 = arith.constant 224 : index
    %c0_17 = arith.constant 0 : index
    %32 = vector.load %arg4[%c224, %c0_17] : memref<416x128xbf16, #tpu.memory_space<vmem>>, vector<64x128xbf16>
    %c288 = arith.constant 288 : index
    %c0_18 = arith.constant 0 : index
    %33 = vector.load %arg4[%c288, %c0_18] : memref<416x128xbf16, #tpu.memory_space<vmem>>, vector<128x32xbf16>
    %34 = tpu.concatenate %8, %8, %8, %8 in 0 : vector<16x128xf32>, vector<16x128xf32>, vector<16x128xf32>, vector<16x128xf32> -> vector<64x128xf32>
    %35 = arith.extf %32 : vector<64x128xbf16> to vector<64x128xf32>
    %36 = arith.mulf %34, %35 : vector<64x128xf32>
    %37 = arith.truncf %36 : vector<64x128xf32> to vector<64x128xbf16>
    %cst_19 = arith.constant dense<0.000000e+00> : vector<64x32xf32>
    %38 = tpu.matmul %37, %33, %cst_19 {dimension_numbers = #tpu.dot_dimension_numbers<[1], [0], [0], [1], [0, 0, 1, 1], [], []>} : vector<64x128xbf16>, vector<128x32xbf16>, vector<64x32xf32> -> vector<64x32xf32>
    %39 = arith.truncf %31 : vector<16x64xf32> to vector<16x64xbf16>
    %40 = arith.truncf %38 : vector<64x32xf32> to vector<64x32xbf16>
    %cst_20 = arith.constant dense<0.000000e+00> : vector<16x32xf32>
    %41 = tpu.matmul %39, %40, %cst_20 {dimension_numbers = #tpu.dot_dimension_numbers<[1], [0], [0], [1], [0, 0, 1, 1], [], []>} : vector<16x64xbf16>, vector<64x32xbf16>, vector<16x32xf32> -> vector<16x32xf32>
    %c0_21 = arith.constant 0 : index
    %c0_22 = arith.constant 0 : index
    %42 = vector.load %arg5[%c0_21, %c0_22] : memref<7x128xf32, #tpu.memory_space<vmem>>, vector<1x32xf32>
    %43 = vector.broadcast %42 : vector<1x32xf32> to vector<16x32xf32>
    %44 = arith.addf %41, %43 : vector<16x32xf32>
    %c3 = arith.constant 3 : index
    %c0_23 = arith.constant 0 : index
    %45 = vector.load %arg5[%c3, %c0_23] : memref<7x128xf32, #tpu.memory_space<vmem>>, vector<1x32xf32>
    %c4 = arith.constant 4 : index
    %c0_24 = arith.constant 0 : index
    %46 = vector.load %arg5[%c4, %c0_24] : memref<7x128xf32, #tpu.memory_space<vmem>>, vector<1x32xf32>
    %cst_25 = arith.constant dense<0.000000e+00> : vector<32xf32>
    %47 = vector.multi_reduction <add>, %44, %cst_25 [0] : vector<16x32xf32> to vector<32xf32>
    %48 = vector.shape_cast %47 : vector<32xf32> to vector<1x32xf32>
    %cst_26 = arith.constant 6.250000e-02 : f32
    %49 = vector.broadcast %cst_26 : f32 to vector<1x32xf32>
    %50 = arith.mulf %48, %49 : vector<1x32xf32>
    %51 = vector.broadcast %50 : vector<1x32xf32> to vector<16x32xf32>
    %52 = arith.subf %44, %51 : vector<16x32xf32>
    %53 = arith.mulf %52, %52 : vector<16x32xf32>
    %cst_27 = arith.constant dense<0.000000e+00> : vector<32xf32>
    %54 = vector.multi_reduction <add>, %53, %cst_27 [0] : vector<16x32xf32> to vector<32xf32>
    %55 = vector.shape_cast %54 : vector<32xf32> to vector<1x32xf32>
    %cst_28 = arith.constant 6.250000e-02 : f32
    %56 = vector.broadcast %cst_28 : f32 to vector<1x32xf32>
    %57 = arith.mulf %55, %56 : vector<1x32xf32>
    %cst_29 = arith.constant 9.99999974E-6 : f32
    %58 = vector.broadcast %cst_29 : f32 to vector<1x32xf32>
    %59 = arith.addf %57, %58 : vector<1x32xf32>
    %60 = math.rsqrt %59 : vector<1x32xf32>
    %61 = vector.broadcast %60 : vector<1x32xf32> to vector<16x32xf32>
    %62 = arith.mulf %52, %61 : vector<16x32xf32>
    %63 = vector.broadcast %45 : vector<1x32xf32> to vector<16x32xf32>
    %64 = arith.mulf %62, %63 : vector<16x32xf32>
    %65 = vector.broadcast %46 : vector<1x32xf32> to vector<16x32xf32>
    %66 = arith.addf %64, %65 : vector<16x32xf32>
    %cst_30 = arith.constant 0.000000e+00 : f32
    %67 = vector.broadcast %cst_30 : f32 to vector<16x32xf32>
    %68 = arith.maximumf %66, %67 : vector<16x32xf32>
    %c32 = arith.constant 32 : index
    %c0_31 = arith.constant 0 : index
    %69 = vector.load %arg4[%c32, %c0_31] : memref<416x128xbf16, #tpu.memory_space<vmem>>, vector<32x128xbf16>
    %70 = arith.truncf %68 : vector<16x32xf32> to vector<16x32xbf16>
    %cst_32 = arith.constant dense<0.000000e+00> : vector<16x128xf32>
    %71 = tpu.matmul %70, %69, %cst_32 {dimension_numbers = #tpu.dot_dimension_numbers<[1], [0], [0], [1], [0, 0, 1, 1], [], []>} : vector<16x32xbf16>, vector<32x128xbf16>, vector<16x128xf32> -> vector<16x128xf32>
    %c256 = arith.constant 256 : index
    %c0_33 = arith.constant 0 : index
    %72 = vector.load %arg3[%c256, %c0_33] : memref<704x64xf32, #tpu.memory_space<vmem>>, vector<128x64xf32>
    %c384 = arith.constant 384 : index
    %c0_34 = arith.constant 0 : index
    %73 = vector.load %arg3[%c384, %c0_34] : memref<704x64xf32, #tpu.memory_space<vmem>>, vector<128x64xf32>
    %cst_35 = arith.constant dense<0.000000e+00> : vector<16x64xf32>
    %74 = tpu.matmul %71, %72, %cst_35 {dimension_numbers = #tpu.dot_dimension_numbers<[1], [0], [0], [1], [0, 0, 1, 1], [], []>} : vector<16x128xf32>, vector<128x64xf32>, vector<16x64xf32> -> vector<16x64xf32>
    %cst_36 = arith.constant dense<0.000000e+00> : vector<16x64xf32>
    %75 = tpu.matmul %71, %73, %cst_36 {dimension_numbers = #tpu.dot_dimension_numbers<[1], [0], [0], [1], [0, 0, 1, 1], [], []>} : vector<16x128xf32>, vector<128x64xf32>, vector<16x64xf32> -> vector<16x64xf32>
    %76 = arith.mulf %75, %3 : vector<16x64xf32>
    %cst_37 = arith.constant dense<0.000000e+00> : vector<64xf32>
    %77 = vector.multi_reduction <add>, %76, %cst_37 [0] : vector<16x64xf32> to vector<64xf32>
    %78 = vector.shape_cast %77 : vector<64xf32> to vector<1x64xf32>
    %79 = vector.broadcast %78 : vector<1x64xf32> to vector<16x64xf32>
    %80 = arith.addf %74, %79 : vector<16x64xf32>
    %cst_38 = arith.constant 2.000000e-01 : f32
    %81 = vector.broadcast %cst_38 : f32 to vector<16x64xf32>
    %82 = arith.mulf %81, %80 : vector<16x64xf32>
    %83 = arith.maximumf %80, %82 : vector<16x64xf32>
    %84 = arith.addf %83, %1 : vector<16x64xf32>
    %cst_39 = arith.constant dense<0xFF800000> : vector<16xf32>
    %85 = vector.multi_reduction <maximumf>, %84, %cst_39 [1] : vector<16x64xf32> to vector<16xf32>
    %86 = vector.shape_cast %85 : vector<16xf32> to vector<16x1xf32>
    %87 = vector.broadcast %86 : vector<16x1xf32> to vector<16x64xf32>
    %88 = arith.subf %84, %87 : vector<16x64xf32>
    %89 = math.exp %88 : vector<16x64xf32>
    %cst_40 = arith.constant dense<0.000000e+00> : vector<16x64xf32>
    %90 = tpu.matmul %89, %4, %cst_40 {dimension_numbers = #tpu.dot_dimension_numbers<[1], [0], [0], [1], [0, 0, 1, 1], [], []>} : vector<16x64xf32>, vector<64x64xf32>, vector<16x64xf32> -> vector<16x64xf32>
    %cst_41 = arith.constant 9.99999968E-21 : f32
    %91 = vector.broadcast %cst_41 : f32 to vector<16x64xf32>
    %92 = arith.maximumf %90, %91 : vector<16x64xf32>
    %93 = tpu.reciprocal %92 {approx = true} : vector<16x64xf32> -> vector<16x64xf32>
    %94 = arith.mulf %89, %93 : vector<16x64xf32>
    %c224_42 = arith.constant 224 : index
    %c0_43 = arith.constant 0 : index
    %95 = vector.load %arg4[%c224_42, %c0_43] : memref<416x128xbf16, #tpu.memory_space<vmem>>, vector<64x128xbf16>
    %c288_44 = arith.constant 288 : index
    %c0_45 = arith.constant 0 : index
    %96 = vector.load %arg4[%c288_44, %c0_45] : memref<416x128xbf16, #tpu.memory_space<vmem>>, vector<128x32xbf16>
    %97 = tpu.concatenate %71, %71, %71, %71 in 0 : vector<16x128xf32>, vector<16x128xf32>, vector<16x128xf32>, vector<16x128xf32> -> vector<64x128xf32>
    %98 = arith.extf %95 : vector<64x128xbf16> to vector<64x128xf32>
    %99 = arith.mulf %97, %98 : vector<64x128xf32>
    %100 = arith.truncf %99 : vector<64x128xf32> to vector<64x128xbf16>
    %cst_46 = arith.constant dense<0.000000e+00> : vector<64x32xf32>
    %101 = tpu.matmul %100, %96, %cst_46 {dimension_numbers = #tpu.dot_dimension_numbers<[1], [0], [0], [1], [0, 0, 1, 1], [], []>} : vector<64x128xbf16>, vector<128x32xbf16>, vector<64x32xf32> -> vector<64x32xf32>
    %102 = arith.truncf %94 : vector<16x64xf32> to vector<16x64xbf16>
    %103 = arith.truncf %101 : vector<64x32xf32> to vector<64x32xbf16>
    %cst_47 = arith.constant dense<0.000000e+00> : vector<16x32xf32>
    %104 = tpu.matmul %102, %103, %cst_47 {dimension_numbers = #tpu.dot_dimension_numbers<[1], [0], [0], [1], [0, 0, 1, 1], [], []>} : vector<16x64xbf16>, vector<64x32xbf16>, vector<16x32xf32> -> vector<16x32xf32>
    %c1 = arith.constant 1 : index
    %c0_48 = arith.constant 0 : index
    %105 = vector.load %arg5[%c1, %c0_48] : memref<7x128xf32, #tpu.memory_space<vmem>>, vector<1x32xf32>
    %106 = vector.broadcast %105 : vector<1x32xf32> to vector<16x32xf32>
    %107 = arith.addf %104, %106 : vector<16x32xf32>
    %c5 = arith.constant 5 : index
    %c0_49 = arith.constant 0 : index
    %108 = vector.load %arg5[%c5, %c0_49] : memref<7x128xf32, #tpu.memory_space<vmem>>, vector<1x32xf32>
    %c6 = arith.constant 6 : index
    %c0_50 = arith.constant 0 : index
    %109 = vector.load %arg5[%c6, %c0_50] : memref<7x128xf32, #tpu.memory_space<vmem>>, vector<1x32xf32>
    %cst_51 = arith.constant dense<0.000000e+00> : vector<32xf32>
    %110 = vector.multi_reduction <add>, %107, %cst_51 [0] : vector<16x32xf32> to vector<32xf32>
    %111 = vector.shape_cast %110 : vector<32xf32> to vector<1x32xf32>
    %cst_52 = arith.constant 6.250000e-02 : f32
    %112 = vector.broadcast %cst_52 : f32 to vector<1x32xf32>
    %113 = arith.mulf %111, %112 : vector<1x32xf32>
    %114 = vector.broadcast %113 : vector<1x32xf32> to vector<16x32xf32>
    %115 = arith.subf %107, %114 : vector<16x32xf32>
    %116 = arith.mulf %115, %115 : vector<16x32xf32>
    %cst_53 = arith.constant dense<0.000000e+00> : vector<32xf32>
    %117 = vector.multi_reduction <add>, %116, %cst_53 [0] : vector<16x32xf32> to vector<32xf32>
    %118 = vector.shape_cast %117 : vector<32xf32> to vector<1x32xf32>
    %cst_54 = arith.constant 6.250000e-02 : f32
    %119 = vector.broadcast %cst_54 : f32 to vector<1x32xf32>
    %120 = arith.mulf %118, %119 : vector<1x32xf32>
    %cst_55 = arith.constant 9.99999974E-6 : f32
    %121 = vector.broadcast %cst_55 : f32 to vector<1x32xf32>
    %122 = arith.addf %120, %121 : vector<1x32xf32>
    %123 = math.rsqrt %122 : vector<1x32xf32>
    %124 = vector.broadcast %123 : vector<1x32xf32> to vector<16x32xf32>
    %125 = arith.mulf %115, %124 : vector<16x32xf32>
    %126 = vector.broadcast %108 : vector<1x32xf32> to vector<16x32xf32>
    %127 = arith.mulf %125, %126 : vector<16x32xf32>
    %128 = vector.broadcast %109 : vector<1x32xf32> to vector<16x32xf32>
    %129 = arith.addf %127, %128 : vector<16x32xf32>
    %cst_56 = arith.constant 0.000000e+00 : f32
    %130 = vector.broadcast %cst_56 : f32 to vector<16x32xf32>
    %131 = arith.maximumf %129, %130 : vector<16x32xf32>
    %c64 = arith.constant 64 : index
    %c0_57 = arith.constant 0 : index
    %132 = vector.load %arg4[%c64, %c0_57] : memref<416x128xbf16, #tpu.memory_space<vmem>>, vector<32x64xbf16>
    %133 = arith.truncf %131 : vector<16x32xf32> to vector<16x32xbf16>
    %cst_58 = arith.constant dense<0.000000e+00> : vector<16x64xf32>
    %134 = tpu.matmul %133, %132, %cst_58 {dimension_numbers = #tpu.dot_dimension_numbers<[1], [0], [0], [1], [0, 0, 1, 1], [], []>} : vector<16x32xbf16>, vector<32x64xbf16>, vector<16x64xf32> -> vector<16x64xf32>
    %c512 = arith.constant 512 : index
    %c0_59 = arith.constant 0 : index
    %135 = vector.load %arg3[%c512, %c0_59] : memref<704x64xf32, #tpu.memory_space<vmem>>, vector<64x64xf32>
    %c576 = arith.constant 576 : index
    %c0_60 = arith.constant 0 : index
    %136 = vector.load %arg3[%c576, %c0_60] : memref<704x64xf32, #tpu.memory_space<vmem>>, vector<64x64xf32>
    %cst_61 = arith.constant dense<0.000000e+00> : vector<16x64xf32>
    %137 = tpu.matmul %134, %135, %cst_61 {dimension_numbers = #tpu.dot_dimension_numbers<[1], [0], [0], [1], [0, 0, 1, 1], [], []>} : vector<16x64xf32>, vector<64x64xf32>, vector<16x64xf32> -> vector<16x64xf32>
    %cst_62 = arith.constant dense<0.000000e+00> : vector<16x64xf32>
    %138 = tpu.matmul %134, %136, %cst_62 {dimension_numbers = #tpu.dot_dimension_numbers<[1], [0], [0], [1], [0, 0, 1, 1], [], []>} : vector<16x64xf32>, vector<64x64xf32>, vector<16x64xf32> -> vector<16x64xf32>
    %139 = arith.mulf %138, %3 : vector<16x64xf32>
    %cst_63 = arith.constant dense<0.000000e+00> : vector<64xf32>
    %140 = vector.multi_reduction <add>, %139, %cst_63 [0] : vector<16x64xf32> to vector<64xf32>
    %141 = vector.shape_cast %140 : vector<64xf32> to vector<1x64xf32>
    %142 = vector.broadcast %141 : vector<1x64xf32> to vector<16x64xf32>
    %143 = arith.addf %137, %142 : vector<16x64xf32>
    %cst_64 = arith.constant 2.000000e-01 : f32
    %144 = vector.broadcast %cst_64 : f32 to vector<16x64xf32>
    %145 = arith.mulf %144, %143 : vector<16x64xf32>
    %146 = arith.maximumf %143, %145 : vector<16x64xf32>
    %147 = arith.addf %146, %1 : vector<16x64xf32>
    %cst_65 = arith.constant dense<0xFF800000> : vector<16xf32>
    %148 = vector.multi_reduction <maximumf>, %147, %cst_65 [1] : vector<16x64xf32> to vector<16xf32>
    %149 = vector.shape_cast %148 : vector<16xf32> to vector<16x1xf32>
    %150 = vector.broadcast %149 : vector<16x1xf32> to vector<16x64xf32>
    %151 = arith.subf %147, %150 : vector<16x64xf32>
    %152 = math.exp %151 : vector<16x64xf32>
    %cst_66 = arith.constant dense<0.000000e+00> : vector<16x64xf32>
    %153 = tpu.matmul %152, %4, %cst_66 {dimension_numbers = #tpu.dot_dimension_numbers<[1], [0], [0], [1], [0, 0, 1, 1], [], []>} : vector<16x64xf32>, vector<64x64xf32>, vector<16x64xf32> -> vector<16x64xf32>
    %cst_67 = arith.constant 9.99999968E-21 : f32
    %154 = vector.broadcast %cst_67 : f32 to vector<16x64xf32>
    %155 = arith.maximumf %153, %154 : vector<16x64xf32>
    %156 = tpu.reciprocal %155 {approx = true} : vector<16x64xf32> -> vector<16x64xf32>
    %157 = arith.mulf %152, %156 : vector<16x64xf32>
    %c96 = arith.constant 96 : index
    %c0_68 = arith.constant 0 : index
    %158 = vector.load %arg4[%c96, %c0_68] : memref<416x128xbf16, #tpu.memory_space<vmem>>, vector<64x64xbf16>
    %c160 = arith.constant 160 : index
    %c0_69 = arith.constant 0 : index
    %159 = vector.load %arg4[%c160, %c0_69] : memref<416x128xbf16, #tpu.memory_space<vmem>>, vector<64x16xbf16>
    %160 = tpu.concatenate %134, %134, %134, %134 in 0 : vector<16x64xf32>, vector<16x64xf32>, vector<16x64xf32>, vector<16x64xf32> -> vector<64x64xf32>
    %161 = arith.extf %158 : vector<64x64xbf16> to vector<64x64xf32>
    %162 = arith.mulf %160, %161 : vector<64x64xf32>
    %163 = arith.truncf %162 : vector<64x64xf32> to vector<64x64xbf16>
    %cst_70 = arith.constant dense<0.000000e+00> : vector<64x16xf32>
    %164 = tpu.matmul %163, %159, %cst_70 {dimension_numbers = #tpu.dot_dimension_numbers<[1], [0], [0], [1], [0, 0, 1, 1], [], []>} : vector<64x64xbf16>, vector<64x16xbf16>, vector<64x16xf32> -> vector<64x16xf32>
    %165 = arith.truncf %157 : vector<16x64xf32> to vector<16x64xbf16>
    %166 = arith.truncf %164 : vector<64x16xf32> to vector<64x16xbf16>
    %cst_71 = arith.constant dense<0.000000e+00> : vector<16x16xf32>
    %167 = tpu.matmul %165, %166, %cst_71 {dimension_numbers = #tpu.dot_dimension_numbers<[1], [0], [0], [1], [0, 0, 1, 1], [], []>} : vector<16x64xbf16>, vector<64x16xbf16>, vector<16x16xf32> -> vector<16x16xf32>
    %c2 = arith.constant 2 : index
    %c0_72 = arith.constant 0 : index
    %168 = vector.load %arg5[%c2, %c0_72] : memref<7x128xf32, #tpu.memory_space<vmem>>, vector<1x16xf32>
    %169 = vector.broadcast %168 : vector<1x16xf32> to vector<16x16xf32>
    %170 = arith.addf %167, %169 : vector<16x16xf32>
    %c0_73 = arith.constant 0 : index
    %c0_74 = arith.constant 0 : index
    %171 = vector.load %arg1[%c0_73, %c0_74] : memref<2x16xbf16, #tpu.memory_space<vmem>>, vector<2x16xbf16>
    %172 = arith.truncf %170 : vector<16x16xf32> to vector<16x16xbf16>
    %cst_75 = arith.constant dense<0.000000e+00> : vector<2x16xf32>
    %173 = tpu.matmul %171, %172, %cst_75 {dimension_numbers = #tpu.dot_dimension_numbers<[1], [0], [0], [1], [0, 0, 1, 1], [], []>} : vector<2x16xbf16>, vector<16x16xbf16>, vector<2x16xf32> -> vector<2x16xf32>
    %c0_76 = arith.constant 0 : index
    %c0_77 = arith.constant 0 : index
    %174 = vector.load %arg6[%c0_76, %c0_77] : memref<2x16xf32, #tpu.memory_space<vmem>>, vector<2x16xf32>
    tpu.vector_store %arg6[%c0_76, %c0_77], %173 {strides = array<i32>} : memref<2x16xf32, #tpu.memory_space<vmem>>, vector<2x16xf32>,
    return
  }
}

</mosaic_0001>

<bundles_post_ra>
// kernel: tpu_custom_call.1
= control target key start
LH: loop header
LB: loop body
LE: loop exit
PB: predicated region body
PF: predicated region fallthrough
CT: control target
= control target key end

     0   :  { %vm60_vm0 = vcmask 261120   ;;  %s1864_s0 = inlined_call_operand.vmem [shape: f32[16,32], index: 0, kind: input, shape index: {}]   ;;  %s1865_s1 = inlined_call_operand.vmem [shape: bf16[2,16], index: 1, kind: input, shape index: {}]   ;;  %s1866_s2 = inlined_call_operand.vmem [shape: bf16[32,64], index: 2, kind: input, shape index: {}]   ;;  %s1867_s3 = inlined_call_operand.vmem [shape: f32[704,64], index: 3, kind: input, shape index: {}]   ;;  %s1868_s4 = inlined_call_operand.vmem [shape: bf16[416,128], index: 4, kind: input, shape index: {}]   ;;  %s1869_s5 = inlined_call_operand.vmem [shape: f32[7,128], index: 5, kind: input, shape index: {}]   ;;  %s1870_s6 = inlined_call_operand.hbm [shape: f32[2,16], index: 6, kind: output, shape index: {}]  }
   0x1   :  { %v1123_v0 = vld [vmem:[%s1868_s4 + $0x8] sm:$0xff]  ;;  %v1122_v1 = vld [vmem:[%s1868_s4] sm:$0xff]  ;;  %v109_v3 = vld [vmem:[%s1867_s3 + $0xf8] sm:$0xff] }
   0x2   :  { %v41_v2 = vld [vmem:[%s1864_s0] sm:$0xff]  ;;  %v93_v4 = vld [vmem:[%s1867_s3 + $0x78] sm:$0xff]  ;;  %70 = vmatpush.bf16.msra.mxu0 %v1123_v0  ;;  %v42_v5 = vld [vmem:[%s1864_s0 + $0x8] sm:$0xff]  ;;  %110 = vmatpush.msra.mxu1 %v109_v3 }
   0x3   :  { %v108_v6 = vld [vmem:[%s1867_s3 + $0xf0] sm:$0xff]  ;;  %145 = vmatpush.msra.mxu3 %v93_v4  ;;  %v107_v8 = vld [vmem:[%s1867_s3 + $0xe8] sm:$0xff]  ;;  %v47_v10 = vpack.c.bf16 %v42_v5, %v41_v2  ;;  %v106_v11 = vld [vmem:[%s1867_s3 + $0xe0] sm:$0xff] }
   0x4   :  { %v92_v7 = vld [vmem:[%s1867_s3 + $0x70] sm:$0xff]  ;;  %111 = vmatpush.msra.mxu1 %v108_v6  ;;  %v91_v9 = vld [vmem:[%s1867_s3 + $0x68] sm:$0xff]  ;;  %v90_v12 = vld [vmem:[%s1867_s3 + $0x60] sm:$0xff] }
   0x5   :  { %146 = vmatpush.msra.mxu3 %v92_v7  ;;  %v1326_v13 = vld [vmem:[%s1868_s4 + $0xc8] sm:$0xff]  ;;  %v105_v14 = vld [vmem:[%s1867_s3 + $0xd8] sm:$0xff]  ;;  %v1338_v16 = vld [vmem:[%s1868_s4 + $0xc0] sm:$0xff] }
   0x6   :  { %71 = vmatpush.bf16.msra.mxu0 %v1122_v1  ;;  %112 = vmatpush.msra.mxu1 %v107_v8  ;;  %v89_v15 = vld [vmem:[%s1867_s3 + $0x58] sm:$0xff]  ;;  %v104_v17 = vld [vmem:[%s1867_s3 + $0xd0] sm:$0xff]  ;;  %v103_v19 = vld [vmem:[%s1867_s3 + $0xc8] sm:$0xff] }
   0x7   :  { %147 = vmatpush.msra.mxu3 %v91_v9  ;;  %v88_v18 = vld [vmem:[%s1867_s3 + $0x50] sm:$0xff]  ;;  %v87_v20 = vld [vmem:[%s1867_s3 + $0x48] sm:$0xff]  ;;  %v102_v21 = vld [vmem:[%s1867_s3 + $0xc0] sm:$0xff] }
   0x8   :  { %113 = vmatpush.msra.mxu1 %v106_v11  ;;  %v86_v22 = vld [vmem:[%s1867_s3 + $0x40] sm:$0xff]  ;;  %v1363_v23 = vld [vmem:[%s1868_s4 + $0xb8] sm:$0xff] }
   0x9   :  { %1037 = vmatmul.msk.bf16.vlgmr.msra.gmra.mxu0 %vm60_vm0, %v47_v10  ;;  %148 = vmatpush.msra.mxu3 %v90_v12  ;;  %v101_v24 = vld [vmem:[%s1867_s3 + $0xb8] sm:$0xff] }
   0xa   :  { %313 = vmatpush.bf16.msrb.mxu0 %v1326_v13  ;;  %114 = vmatpush.msra.mxu1 %v105_v14 }
   0xb   :  { %149 = vmatpush.msra.mxu3 %v89_v15 }
   0xc   :  { %115 = vmatpush.msra.mxu1 %v104_v17 }
   0xd   :  { %150 = vmatpush.msra.mxu3 %v88_v18 }
   0xe   :  { %314 = vmatpush.bf16.msrb.mxu0 %v1338_v16  ;;  %116 = vmatpush.msra.mxu1 %v103_v19 }
   0xf   :  { %151 = vmatpush.msra.mxu3 %v87_v20 }
  0x10   :  { %11 = vsyncpa [#allocation3], 0  ;;  %117 = vmatpush.msra.mxu1 %v102_v21  ;;  %v85_v25 = vld [vmem:[%s1867_s3 + $0x38] sm:$0xff]  ;;  %v1375_v26 = vld [vmem:[%s1868_s4 + $0xb0] sm:$0xff]  ;;  %vm135_vm1 = vcmask 523264   ;;  %vm994_vm8 = vcmask 130048  }
  0x11   :  { %152 = vmatpush.msra.mxu3 %v86_v22  ;;  %v100_v27 = vld [vmem:[%s1867_s3 + $0xb0] sm:$0xff]  ;;  %v99_v29 = vld [vmem:[%s1867_s3 + $0xa8] sm:$0xff]  ;;  %v98_v32 = vld [vmem:[%s1867_s3 + $0xa0] sm:$0xff]  ;;  %s1251_s16 = smov [#allocation2]   ;;  %s1020_s19 = sshll.u32 %s1870_s6, 4  ;;  %vm1011_vm9 = vcmask 123904   ;;  %s1021_s19 = int_to_ptr.hbm [resolvable:$true] %s1020_s19 }
  0x12   :  { %315 = vmatpush.bf16.msrb.mxu0 %v1363_v23  ;;  %118 = vmatpush.msra.mxu1 %v101_v24  ;;  %v84_v28 = vld [vmem:[%s1867_s3 + $0x30] sm:$0xff]  ;;  %v83_v30 = vld [vmem:[%s1867_s3 + $0x28] sm:$0xff]  ;;  %v82_v33 = vld [vmem:[%s1867_s3 + $0x20] sm:$0xff]  ;;  %s1018_s0 = sshll.u32 %s1251_s16, 4  ;;  %s1019_s0 = int_to_ptr.vmem [resolvable:$true] %s1018_s0 }
  0x13   :  { %153 = vmatpush.msra.mxu3 %v85_v25  ;;  %v1393_v31 = vld [vmem:[%s1868_s4 + $0xa8] sm:$0xff]  ;;  %v97_v34 = vld [vmem:[%s1867_s3 + $0x98] sm:$0xff]  ;;  %v96_v36 = vld [vmem:[%s1867_s3 + $0x90] sm:$0xff] }
  0x14   :  { %119 = vmatpush.msra.mxu1 %v100_v27  ;;  %v81_v35 = vld [vmem:[%s1867_s3 + $0x18] sm:$0xff]  ;;  %v80_v37 = vld [vmem:[%s1867_s3 + $0x10] sm:$0xff]  ;;  %v95_v38 = vld [vmem:[%s1867_s3 + $0x88] sm:$0xff] }
  0x15   :  { %154 = vmatpush.msra.mxu3 %v84_v28  ;;  %v79_v39 = vld [vmem:[%s1867_s3 + $0x8] sm:$0xff]  ;;  %v94_v40 = vld [vmem:[%s1867_s3 + $0x80] sm:$0xff]  ;;  %v1435_v43 = vld [vmem:[%s1868_s4 + $0x98] sm:$0xff] }
  0x16   :  { %316 = vmatpush.bf16.msrb.mxu0 %v1375_v26  ;;  %120 = vmatpush.msra.mxu1 %v99_v29  ;;  %v78_v41 = vld [vmem:[%s1867_s3] sm:$0xff]  ;;  %v1441_v44 = vld [vmem:[%s1868_s4 + $0x90] sm:$0xff]  ;;  %v1458_v53 = vld [vmem:[%s1868_s4 + $0x78] sm:$0xff]  }
  0x17   :  { %155 = vmatpush.msra.mxu3 %v83_v30  ;;  %v1429_v42 = vld [vmem:[%s1868_s4 + $0xa0] sm:$0xff]  ;;  %v1447_v46 = vld [vmem:[%s1868_s4 + $0x70] sm:$0xff]   ;;  %v1155_v54 = vunpack.c.h.bf16 %v1458_v53  ;;  %v1154_v55 = vunpack.c.l.bf16 %v1458_v53  ;;  %v1480_v1 = vld [vmem:[%s1868_s4 + $0x88] sm:$0xff]  }
  0x18   :  { %121 = vmatpush.msra.mxu1 %v98_v32  ;;  %v1150_v47 = vunpack.c.l.bf16 %v1447_v46  ;;  %v1151_v48 = vunpack.c.h.bf16 %v1447_v46  ;;  %v1469_v59 = vld [vmem:[%s1868_s4 + $0x80] sm:$0xff]   ;;  %v1163_v2 = vunpack.c.h.bf16 %v1480_v1  ;;  %v1162_v3 = vunpack.c.l.bf16 %v1480_v1  ;;  %v1180_v7 = vld [vmem:[%s1866_s2 + $0x8] sm:$0xff]   ;;  %v1506_v28 = vld [vmem:[%s1867_s3 + $0x2b8] sm:$0xff] }
  0x19   :  { %156 = vmatpush.msra.mxu3 %v82_v33  ;;  %v1159_v60 = vunpack.c.h.bf16 %v1469_v59  ;;  %v1158_v61 = vunpack.c.l.bf16 %v1469_v59  ;;  %v1491_v9 = vunpack.c.l.bf16 %v1180_v7  ;;  %v1493_v10 = vunpack.c.h.bf16 %v1180_v7  ;;  %v1511_v29 = vld [vmem:[%s1867_s3 + $0x2b0] sm:$0xff]  ;;  %v1518_v32 = vld [vmem:[%s1867_s3 + $0x2a8] sm:$0xff] }
  0x1a   :  { %317 = vmatpush.bf16.msrb.mxu0 %v1393_v31  ;;  %122 = vmatpush.msra.mxu1 %v97_v34 }
  0x1b   :  { %157 = vmatpush.msra.mxu3 %v81_v35  ;;  %v1141_v35 = vld [vmem:[%s1866_s2] sm:$0xff]  }
  0x1c   :  { %123 = vmatpush.msra.mxu1 %v96_v36 }
  0x1d   :  { %158 = vmatpush.msra.mxu3 %v80_v37 }
  0x1e   :  { %124 = vmatpush.msra.mxu1 %v95_v38  ;;  %318 = vmatpush.bf16.msrb.mxu0 %v1429_v42 }
  0x1f   :  { %159 = vmatpush.msra.mxu3 %v79_v39  ;;  %v1527_v39 = vunpack.c.l.bf16 %v1141_v35 }
  0x20   :  { %125 = vmatpush.msra.mxu1 %v94_v40 }
  0x21   :  { %160 = vmatpush.msra.mxu3 %v78_v41  ;;  %v1532_v41 = vld [vmem:[%s1867_s3 + $0x2a0] sm:$0xff] }
  0x22   :  { %319 = vmatpush.bf16.msrb.mxu0 %v1435_v43  ;;  %568 = vmatpush.msrb.mxu1 %v1506_v28 }
  0x23   :  { %200 = vmatpush.msrb.mxu3 %v1506_v28 }
  0x24   :  { %569 = vmatpush.msrb.mxu1 %v1511_v29 }
  0x25   :  { %201 = vmatpush.msrb.mxu3 %v1511_v29 }
  0x26   :  { %320 = vmatpush.bf16.msrb.mxu0 %v1441_v44  ;;  %570 = vmatpush.msrb.mxu1 %v1518_v32 }
  0x27   :  { %202 = vmatpush.msrb.mxu3 %v1518_v32 }
  0x28   :  { %571 = vmatpush.msrb.mxu1 %v1532_v41 }
  0x29   :  { %203 = vmatpush.msrb.mxu3 %v1532_v41 }
  0x86   :  { %v73_v45 = vpop.f32.mrf.mxu0 }
  0x87   :  { %126 = vmatmul.f32.vlgmr.msra.gmra.mxu1 %v73_v45  ;;  %161 = vmatmul.f32.vlgmr.msra.gmra.mxu3 %v73_v45  ;;  %v253_v50 = vmul.f32 %v1150_v47, %v73_v45  ;;  %v255_v57 = vmul.f32 %v1154_v55, %v73_v45  ;;  %v257_v63 = vmul.f32 %v1158_v61, %v73_v45 }
  0x88   :  { %v259_v5 = vmul.f32 %v1162_v3, %v73_v45  ;;  %v1537_v45 = vld [vmem:[%s1867_s3 + $0x298] sm:$0xff] }
  0x89   :  { %204 = vmatpush.msrb.mxu3 %v1537_v45  ;;  %572 = vmatpush.msrb.mxu1 %v1537_v45 }
  0x8e   :  { %v75_v49 = vpop.f32.mrf.mxu0 }
  0x8f   :  { %129 = vmatmul.f32.gmra.mxu1 %v75_v49  ;;  %164 = vmatmul.f32.gmra.mxu3 %v75_v49  ;;  %v254_v51 = vmul.f32 %v1151_v48, %v75_v49  ;;  %v256_v56 = vmul.f32 %v1155_v54, %v75_v49  ;;  %v258_v62 = vmul.f32 %v1159_v60, %v75_v49 }
  0x90   :  { %v260_v4 = vmul.f32 %v1163_v2, %v75_v49 }
  0x91   :  { %v261_v52 = vpack.c.bf16 %v254_v51, %v253_v50  ;;  %v262_v58 = vpack.c.bf16 %v256_v56, %v255_v57  ;;  %v263_v0 = vpack.c.bf16 %v258_v62, %v257_v63  ;;  %v1544_v51 = vld [vmem:[%s1867_s3 + $0x290] sm:$0xff]  ;;  %v1552_v56 = vld [vmem:[%s1867_s3 + $0x288] sm:$0xff]  ;;  %v1557_v62 = vunpack.c.h.bf16 %v1141_v35 }
  0x92   :  { %v264_v6 = vpack.c.bf16 %v260_v4, %v259_v5  ;;  %205 = vmatpush.msrb.mxu3 %v1544_v51  ;;  %573 = vmatpush.msrb.mxu1 %v1544_v51 }
  0x93   :  { %321 = vmatmul.bf16.vlgmr.msrb.gmra.mxu0 %v261_v52 }
  0x94   :  { %206 = vmatpush.msrb.mxu3 %v1552_v56  ;;  %574 = vmatpush.msrb.mxu1 %v1552_v56 }
  0xa3   :  { %326 = vmatmul.bf16.gmra.mxu0 %v262_v58 }
  0xb3   :  { %331 = vmatmul.bf16.gmra.mxu0 %v263_v0  ;;  %v1564_v0 = vld [vmem:[%s1867_s3 + $0x280] sm:$0xff] }
  0xb4   :  { %207 = vmatpush.msrb.mxu3 %v1564_v0  ;;  %575 = vmatpush.msrb.mxu1 %v1564_v0 }
  0xb6   :  { %601 = vmatpush.bf16.msra.mxu1 %v1326_v13 }
  0xba   :  { %602 = vmatpush.bf16.msra.mxu1 %v1338_v16 }
  0xbe   :  { %603 = vmatpush.bf16.msra.mxu1 %v1363_v23 }
  0xc2   :  { %604 = vmatpush.bf16.msra.mxu1 %v1375_v26 }
  0xc3   :  { %336 = vmatmul.bf16.gmra.mxu0 %v264_v6 }
  0xc6   :  { %605 = vmatpush.bf16.msra.mxu1 %v1393_v31 }
  0xca   :  { %606 = vmatpush.bf16.msra.mxu1 %v1429_v42 }
  0xce   :  { %607 = vmatpush.bf16.msra.mxu1 %v1435_v43 }
  0xd2   :  { %608 = vmatpush.bf16.msra.mxu1 %v1441_v44 }
 0x104   :  { %v127_v8 = vpop.f32.mrf.mxu1 }
 0x105   :  { %v133_v11 = vmul.f32 %v1491_v9, %v127_v8 }
 0x107   :  { %v136_v15 = vsel %vm135_vm1, %v133_v11, 0.0 }
 0x10a   :  { %v162_v21 = vpop.f32.mrf.mxu3 }
 0x10c   :  { %v130_v12 = vpop.f32.mrf.mxu1 }
 0x10d   :  { %v134_v14 = vmul.f32 %v1493_v10, %v130_v12 }
 0x10f   :  { %v137_v17 = vsel %vm135_vm1, %v134_v14, 0.0 }
 0x110   :  { %v138_v18 = vadd.f32 %v137_v17, %v136_v15  ;;  %v1499_v19 = vpop.f32.mrf.mxu0 }
 0x112   :  { %v139_v20 = vrot.slane %v138_v18, 4  ;;  %v165_v34 = vpop.f32.mrf.mxu3 }
 0x114   :  { %v140_v22 = vadd.f32 %v139_v20, %v138_v18 }
 0x116   :  { %v141_v24 = vrot.slane %v140_v22, 2 }
 0x118   :  { %v142_v25 = vadd.f32 %v141_v24, %v140_v22  ;;  %v1501_v27 = vpop.f32.mrf.mxu0 }
 0x119   :  { %v343_v23 = vpack.c.bf16 %v1501_v27, %v1499_v19 }
 0x11a   :  { %v143_v30 = vrot.slane %v142_v25, 1 }
 0x11c   :  { %v144_v33 = vadd.f32 %v143_v30, %v142_v25 }
 0x11e   :  { %v163_v36 = vadd.f32 %v162_v21, %v144_v33  ;;  %v166_v37 = vadd.f32 %v165_v34, %v144_v33  ;;  %v1190_v34 = vld [vmem:[%s1869_s5] ss:$0 sm:$0xff] }
 0x120   :  { %v327_v38 = vpop.f32.mrf.mxu0  ;;  %v168_v40 = vmul.f32 0.2, %v163_v36  ;;  %v169_v49 = vmul.f32 0.2, %v166_v37 }
 0x122   :  { %v170_v50 = vmax.f32 %v163_v36, %v168_v40  ;;  %v171_v57 = vmax.f32 %v166_v37, %v169_v49 }
 0x124   :  { %v172_v52 = vadd.f32 %v1527_v39, %v170_v50  ;;  %v173_v4 = vadd.f32 %v1557_v62, %v171_v57 }
 0x126   :  { %v174_v58 = vsel %vm135_vm1, %v172_v52, -inf  ;;  %v177_v5 = vsel %vm135_vm1, %v173_v4, -inf }
 0x127   :  { %175 = vmax.xlane.f32.xlu0 %v174_v58 }
 0x128   :  { %v329_v63 = vpop.f32.mrf.mxu0 }
 0x129   :  { %v344_v16 = vpack.c.bf16 %v329_v63, %v327_v38 }
 0x12f   :  { %178 = vmax.xlane.f32.xlu0 %v177_v5 }
 0x130   :  { %v332_v6 = vpop.f32.mrf.mxu0 }
 0x138   :  { %v334_v7 = vpop.f32.mrf.mxu0 }
 0x139   :  { %v345_v12 = vpack.c.bf16 %v334_v7, %v332_v6 }
 0x140   :  { %v337_v8 = vpop.f32.mrf.mxu0 }
 0x148   :  { %v339_v13 = vpop.f32.mrf.mxu0 }
 0x149   :  { %v346_v11 = vpack.c.bf16 %v339_v13, %v337_v8 }
 0x14b   :  { %356 = vmatpush.bf16.msra.mxu3 %v346_v11 }
 0x14f   :  { %357 = vmatpush.bf16.msra.mxu3 %v345_v12 }
 0x153   :  { %358 = vmatpush.bf16.msra.mxu3 %v344_v16 }
 0x157   :  { %359 = vmatpush.bf16.msra.mxu3 %v343_v23 }
 0x19a   :  { %v176_v26 = vpop.xlane.xlu0 %175 }
 0x19b   :  { %v180_v31 = vsub.f32 %v172_v52, %v176_v26 }
 0x19d   :  { %v182_v14 = vmul.f32 1.442695, %v180_v31 }
 0x19f   :  { %1197 = vpow2.f32 %v182_v14  ;;  %v1133_v14 = vld [vmem:[%s1868_s4 + $0x18] sm:$0xff] }
 0x1a0   :  { %439 = vmatpush.bf16.msra.mxu0 %v1133_v14 }
 0x1a2   :  { %v179_v42 = vpop.xlane.xlu0 %178 }
 0x1a3   :  { %v181_v15 = vsub.f32 %v173_v4, %v179_v42 }
 0x1a5   :  { %v1198_v43 = vpop.eup %1197  ;;  %v184_v17 = vmul.f32 1.442695, %v181_v15 }
 0x1a6   :  { %1038 = vmatmul.msk.f32.vlgmr.msrb.gmra.mxu3 %vm135_vm1, %v1198_v43 }
 0x1a7   :  { %1199 = vpow2.f32 %v184_v17 }
 0x1ad   :  { %v1200_v44 = vpop.eup %1199 }
 0x1ae   :  { %1039 = vmatmul.msk.f32.gmra.mxu3 %vm135_vm1, %v1200_v44 }
 0x229   :  { %v209_v18 = vpop.f32.mrf.mxu3 }
 0x22a   :  { %v215_v20 = vmax.f32 %v209_v18, 1e-20  ;;  %v478_v18 = vld [vmem:[%s1867_s3 + $0x1f8] sm:$0xff] }
 0x22b   :  { %479 = vmatpush.msra.mxu2 %v478_v18 }
 0x22c   :  { %1201 = vrcp.f32 %v215_v20  ;;  %v462_v20 = vld [vmem:[%s1867_s3 + $0x178] sm:$0xff] }
 0x22d   :  { %513 = vmatpush.msrb.mxu3 %v462_v20  ;;  %v463_v20 = vld [vmem:[%s1867_s3 + $0x180] sm:$0xff] }
 0x231   :  { %v212_v21 = vpop.f32.mrf.mxu3 }
 0x232   :  { %v216_v19 = vmax.f32 %v212_v21, 1e-20  ;;  %v1202_v22 = vpop.eup %1201  ;;  %v477_v21 = vld [vmem:[%s1867_s3 + $0x1f0] sm:$0xff] }
 0x233   :  { %v219_v25 = vmul.f32 %v1202_v22, %v1198_v43  ;;  %v1132_v43 = vld [vmem:[%s1868_s4 + $0x10] sm:$0xff]  ;;  %v476_v22 = vld [vmem:[%s1867_s3 + $0x1e8] sm:$0xff]  ;;  %480 = vmatpush.msra.mxu2 %v477_v21  ;;  %v447_v21 = vld [vmem:[%s1867_s3 + $0x100] sm:$0xff] }
 0x234   :  { %1203 = vrcp.f32 %v216_v19  ;;  %440 = vmatpush.bf16.msra.mxu0 %v1132_v43  ;;  %v461_v19 = vld [vmem:[%s1867_s3 + $0x170] sm:$0xff]  ;;  %v448_v43 = vld [vmem:[%s1867_s3 + $0x108] sm:$0xff] }
 0x235   :  { %514 = vmatpush.msrb.mxu3 %v461_v19  ;;  %481 = vmatpush.msra.mxu2 %v476_v22 }
 0x238   :  { %846 = vmatpush.msrb.mxu0 %v1506_v28 }
 0x23a   :  { %v1204_v24 = vpop.eup %1203  ;;  %847 = vmatpush.msrb.mxu0 %v1511_v29  ;;  %v458_v29 = vld [vmem:[%s1867_s3 + $0x158] sm:$0xff] }
 0x23b   :  { %v220_v27 = vmul.f32 %v1204_v24, %v1200_v44  ;;  %v460_v24 = vld [vmem:[%s1867_s3 + $0x168] sm:$0xff] }
 0x23c   :  { %848 = vmatpush.msrb.mxu0 %v1518_v32  ;;  %515 = vmatpush.msrb.mxu3 %v460_v24  ;;  %v457_v32 = vld [vmem:[%s1867_s3 + $0x150] sm:$0xff] }
 0x23d   :  { %v342_v30 = vpack.c.bf16 %v220_v27, %v219_v25  ;;  %v475_v25 = vld [vmem:[%s1867_s3 + $0x1e0] sm:$0xff] }
 0x23e   :  { %v459_v27 = vld [vmem:[%s1867_s3 + $0x160] sm:$0xff]  ;;  %849 = vmatpush.msrb.mxu0 %v1532_v41  ;;  %482 = vmatpush.msra.mxu2 %v475_v25  ;;  %v456_v41 = vld [vmem:[%s1867_s3 + $0x148] sm:$0xff] }
 0x23f   :  { %1072 = vmatmul.msk.bf16.vlgmr.msra.gmra.mxu3 %vm135_vm1, %v342_v30  ;;  %v474_v30 = vld [vmem:[%s1867_s3 + $0x1d8] sm:$0xff] }
 0x240   :  { %516 = vmatpush.msrb.mxu3 %v459_v27  ;;  %850 = vmatpush.msrb.mxu0 %v1537_v45  ;;  %v471_v45 = vld [vmem:[%s1867_s3 + $0x1c0] sm:$0xff] }
 0x241   :  { %483 = vmatpush.msra.mxu2 %v474_v30 }
 0x242   :  { %517 = vmatpush.msrb.mxu3 %v458_v29  ;;  %851 = vmatpush.msrb.mxu0 %v1544_v51  ;;  %v470_v51 = vld [vmem:[%s1867_s3 + $0x1b8] sm:$0xff] }
 0x244   :  { %518 = vmatpush.msrb.mxu3 %v457_v32  ;;  %852 = vmatpush.msrb.mxu0 %v1552_v56  ;;  %v469_v56 = vld [vmem:[%s1867_s3 + $0x1b0] sm:$0xff] }
 0x246   :  { %519 = vmatpush.msrb.mxu3 %v456_v41  ;;  %853 = vmatpush.msrb.mxu0 %v1564_v0  ;;  %v452_v0 = vld [vmem:[%s1867_s3 + $0x128] sm:$0xff] }
 0x2c2   :  { %v361_v33 = vpop.f32.mrf.mxu3 }
 0x2c3   :  { %v362_v35 = vadd.f32 %v1190_v34, %v361_v33  ;;  %v473_v33 = vld [vmem:[%s1867_s3 + $0x1d0] sm:$0xff] }
 0x2c4   :  { %484 = vmatpush.msra.mxu2 %v473_v33 }
 0x2c5   :  { %v368_v38 = vsel %vm60_vm0, %v362_v35, 0.0 }
 0x2ca   :  { %v363_v36 = vpop.f32.mrf.mxu3 }
 0x2cb   :  { %v364_v37 = vadd.f32 %v1190_v34, %v363_v36 }
 0x2cd   :  { %v369_v40 = vsel %vm60_vm0, %v364_v37, 0.0 }
 0x2ce   :  { %v370_v49 = vadd.f32 %v369_v40, %v368_v38  ;;  %v454_v40 = vld [vmem:[%s1867_s3 + $0x138] sm:$0xff] }
 0x2d0   :  { %v371_v50 = vrot.slane %v370_v49, 4 }
 0x2d2   :  { %v372_v52 = vadd.f32 %v371_v50, %v370_v49  ;;  %v453_v50 = vld [vmem:[%s1867_s3 + $0x130] sm:$0xff] }
 0x2d4   :  { %v373_v57 = vrot.slane %v372_v52, 2 }
 0x2d6   :  { %v374_v58 = vadd.f32 %v373_v57, %v372_v52  ;;  %v468_v57 = vld [vmem:[%s1867_s3 + $0x1a8] sm:$0xff] }
 0x2d8   :  { %v375_v63 = vrot.slane %v374_v58, 1 }
 0x2da   :  { %v376_v4 = vadd.f32 %v375_v63, %v374_v58  ;;  %v1191_v63 = vld [vmem:[%s1869_s5 + $0x3] ss:$0 sm:$0xff] }
 0x2dc   :  { %v377_v5 = vmul.f32 0.0625, %v376_v4  ;;  %v467_v4 = vld [vmem:[%s1867_s3 + $0x1a0] sm:$0xff] }
 0x2de   :  { %v1588_v6 = vsub.f32 %v362_v35, %v377_v5  ;;  %v1590_v7 = vsub.f32 %v364_v37, %v377_v5  ;;  %v472_v35 = vld [vmem:[%s1867_s3 + $0x1c8] sm:$0xff]  ;;  %v455_v37 = vld [vmem:[%s1867_s3 + $0x140] sm:$0xff] }
 0x2df   :  { %485 = vmatpush.msra.mxu2 %v472_v35  ;;  %520 = vmatpush.msrb.mxu3 %v455_v37  ;;  %v451_v5 = vld [vmem:[%s1867_s3 + $0x120] sm:$0xff] }
 0x2e0   :  { %v380_v8 = vmul.f32 %v1588_v6, %v1588_v6  ;;  %v381_v13 = vmul.f32 %v1590_v7, %v1590_v7 }
 0x2e1   :  { %486 = vmatpush.msra.mxu2 %v471_v45  ;;  %521 = vmatpush.msrb.mxu3 %v454_v40 }
 0x2e2   :  { %v382_v11 = vsel %vm60_vm0, %v380_v8, 0.0  ;;  %v383_v12 = vsel %vm60_vm0, %v381_v13, 0.0 }
 0x2e3   :  { %v384_v16 = vadd.f32 %v383_v12, %v382_v11  ;;  %487 = vmatpush.msra.mxu2 %v470_v51  ;;  %522 = vmatpush.msrb.mxu3 %v453_v50  ;;  %v1192_v12 = vld [vmem:[%s1869_s5 + $0x4] ss:$0 sm:$0xff] }
 0x2e5   :  { %v385_v23 = vrot.slane %v384_v16, 4  ;;  %488 = vmatpush.msra.mxu2 %v469_v56  ;;  %523 = vmatpush.msrb.mxu3 %v452_v0 }
 0x2e7   :  { %v386_v26 = vadd.f32 %v385_v23, %v384_v16  ;;  %489 = vmatpush.msra.mxu2 %v468_v57  ;;  %v466_v16 = vld [vmem:[%s1867_s3 + $0x198] sm:$0xff]  ;;  %524 = vmatpush.msrb.mxu3 %v451_v5 }
 0x2e8   :  { %v450_v23 = vld [vmem:[%s1867_s3 + $0x118] sm:$0xff] }
 0x2e9   :  { %v387_v31 = vrot.slane %v386_v26, 2  ;;  %490 = vmatpush.msra.mxu2 %v467_v4  ;;  %525 = vmatpush.msrb.mxu3 %v450_v23 }
 0x2eb   :  { %v388_v42 = vadd.f32 %v387_v31, %v386_v26  ;;  %491 = vmatpush.msra.mxu2 %v466_v16 }
 0x2ed   :  { %v389_v15 = vrot.slane %v388_v42, 1 }
 0x2ef   :  { %v390_v17 = vadd.f32 %v389_v15, %v388_v42  ;;  %v464_v15 = vld [vmem:[%s1867_s3 + $0x188] sm:$0xff] }
 0x2f1   :  { %v391_v44 = vmul.f32 0.0625, %v390_v17 }
 0x2f3   :  { %v392_v28 = vadd.f32 1e-05, %v391_v44 }
 0x2f5   :  { %1205 = vrsqrt.f32 %v392_v28  ;;  %vm399_vm3 = vweird.f32 %v392_v28 }
 0x2fb   :  { %v1206_v34 = vpop.eup %1205 }
 0x2fc   :  { %v394_v36 = vmul.f32 %v1206_v34, %v392_v28  ;;  %vm400_vm2 = vweird.f32 %v1206_v34 }
 0x2fd   :  { %vm401_vm4 = vmor %vm399_vm3, %vm400_vm2 }
 0x2fe   :  { %v395_v38 = vmul.f32 %v1206_v34, %v394_v36 }
 0x300   :  { %v396_v49 = vmul.f32 0.5, %v395_v38 }
 0x302   :  { %v397_v52 = vsub.f32 1.5, %v396_v49 }
 0x304   :  { %v398_v58 = vmul.f32 %v1206_v34, %v397_v52 }
 0x306   :  { %v402_v8 = vsel %vm401_vm4, %v1206_v34, %v398_v58 }
 0x307   :  { %v403_v13 = vmul.f32 %v402_v8, %v1588_v6  ;;  %v404_v11 = vmul.f32 %v402_v8, %v1590_v7  ;;  %v465_v6 = vld [vmem:[%s1867_s3 + $0x190] sm:$0xff] }
 0x308   :  { %v449_v7 = vld [vmem:[%s1867_s3 + $0x110] sm:$0xff]  ;;  %492 = vmatpush.msra.mxu2 %v465_v6 }
 0x309   :  { %v406_v26 = vmul.f32 %v1191_v63, %v403_v13  ;;  %v407_v31 = vmul.f32 %v1191_v63, %v404_v11  ;;  %526 = vmatpush.msrb.mxu3 %v449_v7 }
 0x30a   :  { %493 = vmatpush.msra.mxu2 %v464_v15 }
 0x30b   :  { %v409_v14 = vadd.f32 %v1192_v12, %v406_v26  ;;  %v410_v42 = vadd.f32 %v1192_v12, %v407_v31  ;;  %527 = vmatpush.msrb.mxu3 %v448_v43 }
 0x30c   :  { %494 = vmatpush.msra.mxu2 %v463_v20 }
 0x30d   :  { %v411_v17 = vmax.f32 %v409_v14, 0.0  ;;  %v412_v44 = vmax.f32 %v410_v42, 0.0  ;;  %528 = vmatpush.msrb.mxu3 %v447_v21 }
 0x30f   :  { %v417_v18 = vpack.c.bf16 %v412_v44, %v411_v17 }
 0x311   :  { %1081 = vmatmul.msk.bf16.vlgmr.msra.gmra.mxu0 %vm60_vm0, %v417_v18 }
 0x38e   :  { %v442_v19 = vpop.f32.mrf.mxu0 }
 0x38f   :  { %495 = vmatmul.f32.vlgmr.msra.gmra.mxu2 %v442_v19  ;;  %529 = vmatmul.f32.vlgmr.msrb.gmra.mxu3 %v442_v19  ;;  %v589_v31 = vmul.f32 %v1150_v47, %v442_v19  ;;  %v591_v14 = vmul.f32 %v1154_v55, %v442_v19  ;;  %v593_v43 = vmul.f32 %v1158_v61, %v442_v19 }
 0x390   :  { %v595_v47 = vmul.f32 %v1162_v3, %v442_v19 }
 0x396   :  { %v444_v28 = vpop.f32.mrf.mxu0 }
 0x397   :  { %498 = vmatmul.f32.gmra.mxu2 %v444_v28  ;;  %532 = vmatmul.f32.gmra.mxu3 %v444_v28  ;;  %v590_v26 = vmul.f32 %v1151_v48, %v444_v28  ;;  %v592_v7 = vmul.f32 %v1155_v54, %v444_v28  ;;  %v594_v15 = vmul.f32 %v1159_v60, %v444_v28 }
 0x398   :  { %v596_v46 = vmul.f32 %v1163_v2, %v444_v28 }
 0x399   :  { %v597_v6 = vpack.c.bf16 %v590_v26, %v589_v31  ;;  %v598_v42 = vpack.c.bf16 %v592_v7, %v591_v14  ;;  %v599_v48 = vpack.c.bf16 %v594_v15, %v593_v43  ;;  %v1134_v31 = vld [vmem:[%s1868_s4 + $0x20] sm:$0xff]  ;;  %v750_v14 = vld [vmem:[%s1867_s3 + $0x278] sm:$0xff]  ;;  %v749_v15 = vld [vmem:[%s1867_s3 + $0x270] sm:$0xff] }
 0x39a   :  { %v600_v54 = vpack.c.bf16 %v596_v46, %v595_v47  ;;  %v741_v43 = vld [vmem:[%s1867_s3 + $0x230] sm:$0xff]  ;;  %v748_v46 = vld [vmem:[%s1867_s3 + $0x268] sm:$0xff] }
 0x39b   :  { %v740_v47 = vld [vmem:[%s1867_s3 + $0x228] sm:$0xff] }
 0x412   :  { %v496_v22 = vpop.f32.mrf.mxu2  ;;  %v530_v34 = vpop.f32.mrf.mxu3 }
 0x413   :  { %v502_v24 = vmul.f32 %v1491_v9, %v496_v22 }
 0x415   :  { %v504_v30 = vsel %vm135_vm1, %v502_v24, 0.0 }
 0x41a   :  { %v499_v25 = vpop.f32.mrf.mxu2  ;;  %v533_v38 = vpop.f32.mrf.mxu3 }
 0x41b   :  { %v503_v27 = vmul.f32 %v1493_v10, %v499_v25 }
 0x41d   :  { %v505_v29 = vsel %vm135_vm1, %v503_v27, 0.0 }
 0x41e   :  { %v506_v33 = vadd.f32 %v505_v29, %v504_v30 }
 0x420   :  { %v507_v32 = vrot.slane %v506_v33, 4 }
 0x422   :  { %v508_v35 = vadd.f32 %v507_v32, %v506_v33  ;;  %v1193_v32 = vld [vmem:[%s1869_s5 + $0x1] ss:$0 sm:$0xff] }
 0x424   :  { %v509_v41 = vrot.slane %v508_v35, 2 }
 0x426   :  { %v510_v36 = vadd.f32 %v509_v41, %v508_v35 }
 0x428   :  { %v511_v45 = vrot.slane %v510_v36, 1 }
 0x42a   :  { %v512_v37 = vadd.f32 %v511_v45, %v510_v36 }
 0x42c   :  { %v531_v51 = vadd.f32 %v530_v34, %v512_v37  ;;  %v534_v40 = vadd.f32 %v533_v38, %v512_v37 }
 0x42e   :  { %v536_v49 = vmul.f32 0.2, %v531_v51  ;;  %v537_v56 = vmul.f32 0.2, %v534_v40 }
 0x430   :  { %v538_v50 = vmax.f32 %v531_v51, %v536_v49  ;;  %v539_v57 = vmax.f32 %v534_v40, %v537_v56 }
 0x432   :  { %v540_v52 = vadd.f32 %v1527_v39, %v538_v50  ;;  %v541_v58 = vadd.f32 %v1557_v62, %v539_v57 }
 0x434   :  { %v542_v0 = vsel %vm135_vm1, %v540_v52, -inf  ;;  %v545_v63 = vsel %vm135_vm1, %v541_v58, -inf }
 0x435   :  { %543 = vmax.xlane.f32.xlu1 %v542_v0 }
 0x43d   :  { %546 = vmax.xlane.f32.xlu1 %v545_v63 }
 0x4a8   :  { %v544_v4 = vpop.xlane.xlu1 %543 }
 0x4a9   :  { %v548_v5 = vsub.f32 %v540_v52, %v544_v4 }
 0x4ab   :  { %v550_v8 = vmul.f32 1.442695, %v548_v5 }
 0x4ad   :  { %1207 = vpow2.f32 %v550_v8 }
 0x4b0   :  { %v547_v13 = vpop.xlane.xlu1 %546 }
 0x4b1   :  { %v549_v11 = vsub.f32 %v541_v58, %v547_v13 }
 0x4b3   :  { %v1208_v12 = vpop.eup %1207  ;;  %v552_v16 = vmul.f32 1.442695, %v549_v11 }
 0x4b4   :  { %1082 = vmatmul.msk.f32.vlgmr.msrb.gmra.mxu1 %vm135_vm1, %v1208_v12 }
 0x4b5   :  { %1209 = vpow2.f32 %v552_v16  ;;  %v1135_v16 = vld [vmem:[%s1868_s4 + $0x28] sm:$0xff] }
 0x4b6   :  { %727 = vmatpush.bf16.msra.mxu3 %v1135_v16 }
 0x4ba   :  { %728 = vmatpush.bf16.msra.mxu3 %v1134_v31 }
 0x4bb   :  { %v1210_v23 = vpop.eup %1209 }
 0x4bc   :  { %1083 = vmatmul.msk.f32.gmra.mxu1 %vm135_vm1, %v1210_v23 }
 0x4c4   :  { %609 = vmatmul.bf16.vlgmr.msra.gmra.mxu1 %v597_v6 }
 0x4d4   :  { %614 = vmatmul.bf16.gmra.mxu1 %v598_v42  ;;  %v742_v42 = vld [vmem:[%s1867_s3 + $0x238] sm:$0xff] }
 0x4d5   :  { %799 = vmatpush.msrb.mxu3 %v742_v42 }
 0x4d7   :  { %800 = vmatpush.msrb.mxu3 %v741_v43 }
 0x4d9   :  { %801 = vmatpush.msrb.mxu3 %v740_v47 }
 0x4e4   :  { %619 = vmatmul.bf16.gmra.mxu1 %v599_v48 }
 0x4f4   :  { %624 = vmatmul.bf16.gmra.mxu1 %v600_v54  ;;  %v747_v54 = vld [vmem:[%s1867_s3 + $0x260] sm:$0xff] }
 0x531   :  { %v577_v53 = vpop.f32.mrf.mxu1 }
 0x532   :  { %v583_v55 = vmax.f32 %v577_v53, 1e-20  ;;  %v739_v53 = vld [vmem:[%s1867_s3 + $0x220] sm:$0xff] }
 0x533   :  { %802 = vmatpush.msrb.mxu3 %v739_v53 }
 0x534   :  { %1211 = vrcp.f32 %v583_v55  ;;  %v746_v55 = vld [vmem:[%s1867_s3 + $0x258] sm:$0xff] }
 0x539   :  { %v580_v17 = vpop.f32.mrf.mxu1 }
 0x53a   :  { %v584_v44 = vmax.f32 %v580_v17, 1e-20  ;;  %v1212_v60 = vpop.eup %1211  ;;  %v738_v17 = vld [vmem:[%s1867_s3 + $0x218] sm:$0xff] }
 0x53b   :  { %v587_v61 = vmul.f32 %v1212_v60, %v1208_v12  ;;  %v737_v60 = vld [vmem:[%s1867_s3 + $0x210] sm:$0xff]  ;;  %803 = vmatpush.msrb.mxu3 %v738_v17 }
 0x53c   :  { %1213 = vrcp.f32 %v584_v44  ;;  %v745_v44 = vld [vmem:[%s1867_s3 + $0x250] sm:$0xff] }
 0x53d   :  { %804 = vmatpush.msrb.mxu3 %v737_v60 }
 0x541   :  { %v610_v18 = vpop.f32.mrf.mxu1 }
 0x542   :  { %v1214_v59 = vpop.eup %1213 }
 0x543   :  { %v588_v20 = vmul.f32 %v1214_v59, %v1210_v23  ;;  %v744_v59 = vld [vmem:[%s1867_s3 + $0x248] sm:$0xff] }
 0x545   :  { %v630_v21 = vpack.c.bf16 %v588_v20, %v587_v61  ;;  %v736_v61 = vld [vmem:[%s1867_s3 + $0x208] sm:$0xff] }
 0x546   :  { %805 = vmatpush.msrb.mxu3 %v736_v61 }
 0x549   :  { %v612_v22 = vpop.f32.mrf.mxu1 }
 0x54a   :  { %v631_v29 = vpack.c.bf16 %v612_v22, %v610_v18 }
 0x551   :  { %v615_v24 = vpop.f32.mrf.mxu1 }
 0x559   :  { %v617_v2 = vpop.f32.mrf.mxu1 }
 0x55a   :  { %v632_v30 = vpack.c.bf16 %v617_v2, %v615_v24 }
 0x561   :  { %v620_v28 = vpop.f32.mrf.mxu1 }
 0x569   :  { %v622_v1 = vpop.f32.mrf.mxu1 }
 0x56a   :  { %v633_v27 = vpack.c.bf16 %v622_v1, %v620_v28  ;;  %v1194_v28 = vld [vmem:[%s1869_s5 + $0x5] ss:$0 sm:$0xff] }
 0x571   :  { %v625_v3 = vpop.f32.mrf.mxu1 }
 0x579   :  { %v627_v19 = vpop.f32.mrf.mxu1 }
 0x57a   :  { %v634_v25 = vpack.c.bf16 %v627_v19, %v625_v3 }
 0x57c   :  { %644 = vmatpush.bf16.msrb.mxu2 %v634_v25  ;;  %v1195_v25 = vld [vmem:[%s1869_s5 + $0x6] ss:$0 sm:$0xff] }
 0x580   :  { %645 = vmatpush.bf16.msrb.mxu2 %v633_v27 }
 0x584   :  { %646 = vmatpush.bf16.msrb.mxu2 %v632_v30 }
 0x588   :  { %647 = vmatpush.bf16.msrb.mxu2 %v631_v29 }
 0x58b   :  { %1084 = vmatmul.msk.bf16.vlgmr.msrb.gmra.mxu2 %vm135_vm1, %v630_v21 }
 0x58c   :  { %765 = vmatpush.msra.mxu2 %v750_v14 }
 0x58e   :  { %766 = vmatpush.msra.mxu2 %v749_v15 }
 0x590   :  { %767 = vmatpush.msra.mxu2 %v748_v46 }
 0x592   :  { %768 = vmatpush.msra.mxu2 %v747_v54 }
 0x594   :  { %769 = vmatpush.msra.mxu2 %v746_v55 }
 0x596   :  { %770 = vmatpush.msra.mxu2 %v745_v44 }
 0x598   :  { %771 = vmatpush.msra.mxu2 %v744_v59 }
 0x60e   :  { %v649_v33 = vpop.f32.mrf.mxu2 }
 0x60f   :  { %v650_v34 = vadd.f32 %v1193_v32, %v649_v33 }
 0x611   :  { %v656_v36 = vsel %vm60_vm0, %v650_v34, 0.0 }
 0x616   :  { %v651_v35 = vpop.f32.mrf.mxu2 }
 0x617   :  { %v652_v41 = vadd.f32 %v1193_v32, %v651_v35 }
 0x619   :  { %v657_v45 = vsel %vm60_vm0, %v652_v41, 0.0 }
 0x61a   :  { %v658_v37 = vadd.f32 %v657_v45, %v656_v36  ;;  %v735_v36 = vld [vmem:[%s1867_s3 + $0x200] sm:$0xff]  ;;  %v1139_v45 = vld [vmem:[%s1868_s4 + $0x68] sm:$0xff] }
 0x61b   :  { %806 = vmatpush.msrb.mxu3 %v735_v36 }
 0x61c   :  { %v659_v38 = vrot.slane %v658_v37, 4 }
 0x61e   :  { %v660_v51 = vadd.f32 %v659_v38, %v658_v37  ;;  %v1138_v37 = vld [vmem:[%s1868_s4 + $0x60] sm:$0xff]  ;;  %v1137_v38 = vld [vmem:[%s1868_s4 + $0x58] sm:$0xff] }
 0x620   :  { %v661_v40 = vrot.slane %v660_v51, 2 }
 0x622   :  { %v662_v49 = vadd.f32 %v661_v40, %v660_v51  ;;  %v1136_v51 = vld [vmem:[%s1868_s4 + $0x50] sm:$0xff] }
 0x624   :  { %v663_v56 = vrot.slane %v662_v49, 1 }
 0x626   :  { %v664_v50 = vadd.f32 %v663_v56, %v662_v49  ;;  %v1185_v49 = vld [vmem:[%s1868_s4 + $0x30] sm:$0xff]  }
 0x627   :  { %v1167_v56 = vunpack.c.h.bf16 %v1185_v49 }
 0x628   :  { %v665_v52 = vmul.f32 0.0625, %v664_v50 }
 0x62a   :  { %v666_v57 = vsub.f32 %v650_v34, %v665_v52  ;;  %v667_v0 = vsub.f32 %v652_v41, %v665_v52  ;;  %v743_v41 = vld [vmem:[%s1867_s3 + $0x240] sm:$0xff]  ;;  %v1166_v52 = vunpack.c.l.bf16 %v1185_v49 }
 0x62b   :  { %772 = vmatpush.msra.mxu2 %v743_v41 }
 0x62c   :  { %v668_v58 = vmul.f32 %v666_v57, %v666_v57  ;;  %v669_v63 = vmul.f32 %v667_v0, %v667_v0 }
 0x62d   :  { %943 = vmatpush.bf16.msrb.mxu2 %v1139_v45 }
 0x62e   :  { %v670_v4 = vsel %vm60_vm0, %v668_v58, 0.0  ;;  %v671_v5 = vsel %vm60_vm0, %v669_v63, 0.0  ;;  %v1186_v63 = vld [vmem:[%s1868_s4 + $0x38] sm:$0xff]  }
 0x62f   :  { %v672_v8 = vadd.f32 %v671_v5, %v670_v4  ;;  %v1171_v4 = vunpack.c.h.bf16 %v1186_v63  ;;  %v1170_v5 = vunpack.c.l.bf16 %v1186_v63 }
 0x631   :  { %v673_v13 = vrot.slane %v672_v8, 4  ;;  %944 = vmatpush.bf16.msrb.mxu2 %v1138_v37 }
 0x633   :  { %v674_v11 = vadd.f32 %v673_v13, %v672_v8 }
 0x635   :  { %v675_v12 = vrot.slane %v674_v11, 2  ;;  %945 = vmatpush.bf16.msrb.mxu2 %v1137_v38 }
 0x637   :  { %v676_v23 = vadd.f32 %v675_v12, %v674_v11  ;;  %v1187_v12 = vld [vmem:[%s1868_s4 + $0x40] sm:$0xff]  }
 0x638   :  { %v1175_v16 = vunpack.c.h.bf16 %v1187_v12 }
 0x639   :  { %v677_v26 = vrot.slane %v676_v23, 1  ;;  %946 = vmatpush.bf16.msrb.mxu2 %v1136_v51 }
 0x63b   :  { %v678_v6 = vadd.f32 %v677_v26, %v676_v23  ;;  %v1174_v23 = vunpack.c.l.bf16 %v1187_v12 }
 0x63d   :  { %v679_v7 = vmul.f32 0.0625, %v678_v6 }
 0x63f   :  { %v680_v48 = vadd.f32 1e-05, %v679_v7  ;;  %v1188_v7 = vld [vmem:[%s1868_s4 + $0x48] sm:$0xff]  }
 0x640   :  { %v1179_v14 = vunpack.c.h.bf16 %v1188_v7  ;;  %v1178_v42 = vunpack.c.l.bf16 %v1188_v7 }
 0x641   :  { %1215 = vrsqrt.f32 %v680_v48  ;;  %vm687_vm6 = vweird.f32 %v680_v48 }
 0x647   :  { %v1216_v18 = vpop.eup %1215 }
 0x648   :  { %v682_v20 = vmul.f32 %v1216_v18, %v680_v48  ;;  %vm688_vm5 = vweird.f32 %v1216_v18 }
 0x649   :  { %vm689_vm7 = vmor %vm687_vm6, %vm688_vm5 }
 0x64a   :  { %v683_v21 = vmul.f32 %v1216_v18, %v682_v20 }
 0x64c   :  { %v684_v22 = vmul.f32 0.5, %v683_v21 }
 0x64e   :  { %v685_v24 = vsub.f32 1.5, %v684_v22 }
 0x650   :  { %v686_v2 = vmul.f32 %v1216_v18, %v685_v24 }
 0x652   :  { %v690_v1 = vsel %vm689_vm7, %v1216_v18, %v686_v2 }
 0x653   :  { %v691_v3 = vmul.f32 %v690_v1, %v666_v57  ;;  %v692_v19 = vmul.f32 %v690_v1, %v667_v0 }
 0x655   :  { %v694_v27 = vmul.f32 %v1194_v28, %v691_v3  ;;  %v695_v30 = vmul.f32 %v1194_v28, %v692_v19 }
 0x657   :  { %v697_v29 = vadd.f32 %v1195_v25, %v694_v27  ;;  %v698_v33 = vadd.f32 %v1195_v25, %v695_v30 }
 0x659   :  { %v699_v32 = vmax.f32 %v697_v29, 0.0  ;;  %v700_v34 = vmax.f32 %v698_v33, 0.0 }
 0x65b   :  { %v705_v35 = vpack.c.bf16 %v700_v34, %v699_v32 }
 0x65d   :  { %1093 = vmatmul.msk.bf16.vlgmr.msra.gmra.mxu3 %vm60_vm0, %v705_v35 }
 0x6e0   :  { %v730_v40 = vpop.f32.mrf.mxu3 }
 0x6e1   :  { %1094 = vmatmul.msk.f32.vlgmr.msra.gmra.mxu2 %vm135_vm1, %v730_v40  ;;  %1096 = vmatmul.msk.f32.vlgmr.msrb.gmra.mxu3 %vm135_vm1, %v730_v40  ;;  %v891_v0 = vmul.f32 %v1166_v52, %v730_v40  ;;  %v893_v13 = vmul.f32 %v1170_v5, %v730_v40  ;;  %v895_v31 = vmul.f32 %v1174_v23, %v730_v40 }
 0x6e2   :  { %v897_v43 = vmul.f32 %v1178_v42, %v730_v40  ;;  %v992_v42 = vld [vmem:[%s1865_s1] sm:$0x1] }
 0x6e8   :  { %v732_v50 = vpop.f32.mrf.mxu3 }
 0x6e9   :  { %1095 = vmatmul.msk.f32.gmra.mxu2 %vm135_vm1, %v732_v50  ;;  %1097 = vmatmul.msk.f32.gmra.mxu3 %vm135_vm1, %v732_v50  ;;  %v892_v57 = vmul.f32 %v1167_v56, %v732_v50  ;;  %v894_v8 = vmul.f32 %v1171_v4, %v732_v50  ;;  %v896_v26 = vmul.f32 %v1175_v16, %v732_v50 }
 0x6ea   :  { %v898_v15 = vmul.f32 %v1179_v14, %v732_v50 }
 0x6eb   :  { %v899_v58 = vpack.c.bf16 %v892_v57, %v891_v0  ;;  %v900_v11 = vpack.c.bf16 %v894_v8, %v893_v13  ;;  %v901_v6 = vpack.c.bf16 %v896_v26, %v895_v31  ;;  %v1196_v26 = vld [vmem:[%s1869_s5 + $0x2] ss:$0 sm:$0xff] }
 0x6ec   :  { %v902_v48 = vpack.c.bf16 %v898_v15, %v897_v43 }
 0x6f1   :  { %1116 = vmatmul.msk.bf16.vlgmr.msrb.gmra.mxu2 %vm135_vm1, %v899_v58 }
 0x701   :  { %1117 = vmatmul.msk.bf16.gmra.mxu2 %vm135_vm1, %v900_v11 }
 0x711   :  { %1118 = vmatmul.msk.bf16.gmra.mxu2 %vm135_vm1, %v901_v6 }
 0x721   :  { %1119 = vmatmul.msk.bf16.gmra.mxu2 %vm135_vm1, %v902_v48 }
 0x764   :  { %v774_v46 = vpop.f32.mrf.mxu2  ;;  %v808_v18 = vpop.f32.mrf.mxu3 }
 0x765   :  { %v780_v47 = vmul.f32 %v1491_v9, %v774_v46 }
 0x767   :  { %v782_v55 = vsel %vm135_vm1, %v780_v47, 0.0 }
 0x76c   :  { %v777_v54 = vpop.f32.mrf.mxu2  ;;  %v811_v28 = vpop.f32.mrf.mxu3 }
 0x76d   :  { %v781_v53 = vmul.f32 %v1493_v10, %v777_v54 }
 0x76f   :  { %v783_v17 = vsel %vm135_vm1, %v781_v53, 0.0 }
 0x770   :  { %v784_v44 = vadd.f32 %v783_v17, %v782_v55 }
 0x772   :  { %v785_v60 = vrot.slane %v784_v44, 4 }
 0x774   :  { %v786_v59 = vadd.f32 %v785_v60, %v784_v44  ;;  %v948_v61 = vpop.f32.mrf.mxu2 }
 0x776   :  { %v787_v20 = vrot.slane %v786_v59, 2 }
 0x778   :  { %v788_v21 = vadd.f32 %v787_v20, %v786_v59 }
 0x77a   :  { %v789_v22 = vrot.slane %v788_v21, 1 }
 0x77c   :  { %v790_v24 = vadd.f32 %v789_v22, %v788_v21  ;;  %v950_v2 = vpop.f32.mrf.mxu2 }
 0x77e   :  { %v809_v1 = vadd.f32 %v808_v18, %v790_v24  ;;  %v812_v9 = vadd.f32 %v811_v28, %v790_v24 }
 0x780   :  { %v814_v3 = vmul.f32 0.2, %v809_v1  ;;  %v815_v19 = vmul.f32 0.2, %v812_v9 }
 0x782   :  { %v816_v10 = vmax.f32 %v809_v1, %v814_v3  ;;  %v817_v30 = vmax.f32 %v812_v9, %v815_v19 }
 0x784   :  { %v953_v25 = vpop.f32.mrf.mxu2  ;;  %v818_v27 = vadd.f32 %v1527_v39, %v816_v10  ;;  %v819_v33 = vadd.f32 %v1557_v62, %v817_v30  ;;  %v969_v39 = vpack.c.bf16 %v950_v2, %v948_v61 }
 0x786   :  { %v820_v29 = vsel %vm135_vm1, %v818_v27, -inf  ;;  %v823_v34 = vsel %vm135_vm1, %v819_v33, -inf }
 0x787   :  { %821 = vmax.xlane.f32.xlu2 %v820_v29 }
 0x78c   :  { %v955_v32 = vpop.f32.mrf.mxu2 }
 0x78d   :  { %v970_v51 = vpack.c.bf16 %v955_v32, %v953_v25 }
 0x78f   :  { %824 = vmax.xlane.f32.xlu2 %v823_v34 }
 0x794   :  { %v958_v35 = vpop.f32.mrf.mxu2 }
 0x79c   :  { %v960_v41 = vpop.f32.mrf.mxu2 }
 0x79d   :  { %v971_v38 = vpack.c.bf16 %v960_v41, %v958_v35 }
 0x7a4   :  { %v963_v36 = vpop.f32.mrf.mxu2 }
 0x7ac   :  { %v965_v45 = vpop.f32.mrf.mxu2 }
 0x7ad   :  { %v972_v37 = vpack.c.bf16 %v965_v45, %v963_v36 }
 0x7af   :  { %982 = vmatpush.bf16.msra.mxu3 %v972_v37 }
 0x7b3   :  { %983 = vmatpush.bf16.msra.mxu3 %v971_v38 }
 0x7b7   :  { %984 = vmatpush.bf16.msra.mxu3 %v970_v51 }
 0x7bb   :  { %985 = vmatpush.bf16.msra.mxu3 %v969_v39 }
 0x7fa   :  { %v822_v40 = vpop.xlane.xlu2 %821 }
 0x7fb   :  { %v826_v49 = vsub.f32 %v818_v27, %v822_v40 }
 0x7fd   :  { %v828_v56 = vmul.f32 1.442695, %v826_v49 }
 0x7ff   :  { %1217 = vpow2.f32 %v828_v56 }
 0x802   :  { %v825_v62 = vpop.xlane.xlu2 %824 }
 0x803   :  { %v827_v50 = vsub.f32 %v819_v33, %v825_v62 }
 0x805   :  { %v1218_v52 = vpop.eup %1217  ;;  %v830_v57 = vmul.f32 1.442695, %v827_v50 }
 0x806   :  { %1098 = vmatmul.msk.f32.vlgmr.msrb.gmra.mxu0 %vm135_vm1, %v1218_v52 }
 0x807   :  { %1219 = vpow2.f32 %v830_v57 }
 0x80d   :  { %v1220_v0 = vpop.eup %1219 }
 0x80e   :  { %1099 = vmatmul.msk.f32.gmra.mxu0 %vm135_vm1, %v1220_v0 }
 0x883   :  { %v855_v58 = vpop.f32.mrf.mxu0 }
 0x884   :  { %v861_v63 = vmax.f32 %v855_v58, 1e-20 }
 0x886   :  { %1221 = vrcp.f32 %v861_v63 }
 0x88b   :  { %v858_v4 = vpop.f32.mrf.mxu0 }
 0x88c   :  { %v862_v5 = vmax.f32 %v858_v4, 1e-20  ;;  %v1222_v8 = vpop.eup %1221 }
 0x88d   :  { %v865_v11 = vmul.f32 %v1222_v8, %v1218_v52 }
 0x88e   :  { %1223 = vrcp.f32 %v862_v5 }
 0x894   :  { %v1224_v13 = vpop.eup %1223 }
 0x895   :  { %v866_v12 = vmul.f32 %v1224_v13, %v1220_v0 }
 0x897   :  { %v968_v16 = vpack.c.bf16 %v866_v12, %v865_v11 }
 0x899   :  { %1120 = vmatmul.msk.bf16.vlgmr.msra.gmra.mxu3 %vm135_vm1, %v968_v16 }
 0x91c   :  { %v987_v23 = vpop.f32.mrf.mxu3 }
 0x91d   :  { %v988_v6 = vadd.f32 %v1196_v26, %v987_v23 }
 0x924   :  { %v989_v31 = vpop.f32.mrf.mxu3 }
 0x925   :  { %v990_v7 = vadd.f32 %v1196_v26, %v989_v31 }
 0x927   :  { %v993_v14 = vpack.c.bf16 %v990_v7, %v988_v6 }
 0x929   :  { %1005 = vmatpush.bf16.msra.mxu0 %v993_v14 }
 0x92c   :  { %1121 = vmatmul.msk.bf16.vlgmr.msra.gmra.mxu0 %vm994_vm8, %v992_v42 }
 0x9a9   :  { %v1007_v15 = vpop.f32.mrf.mxu0 }
 0x9aa   :  { %1012 = vst.msk [vmem:[#allocation2] sm:$0x3] %vm1011_vm9, %v1007_v15 }
 0x9ab   :  { %1023 = dma.vmem_to_hbm [thread:$0]  %s1019_s0, 32, %s1021_s19, [#allocation3]  }
 0x9b1   :  { %v1009_v43 = vpop.f32.mrf.mxu0 }
 0x9b2   :  { %1249 = dma.done.wait [#allocation3], 32  }
 0x9b3   :  { %1250 = vsyncadd [#allocation3], 4294967264 }
 0x9b4   :  { %1028 = vsyncpa [#allocation3], 1 }

</bundles_post_ra>
